<compile_context>
chip_gen: v7x
topology: tpu7x:2x2x1
jax: 0.10.0
libtpu: 0.0.40
codegen_flags: <defaults>
</compile_context>

<pallas_src>
import functools

import jax
import jax.numpy as jnp
from jax import lax
from jax.experimental import pallas as pl
from jax.experimental.pallas import tpu as pltpu

# ----------------------------- model constants -----------------------------
B = 2                   # default batch for the latency test
L = 64                  # input_feature_size
NUM_CLASSES = 8
K = 5                   # Conv1d kernel_size
KP = 8                  # conv1 im2col patch width padded 5 -> 8 (extra weight rows are 0)
PAD = 1                 # Conv1d padding
C1, C2, C3 = 32, 64, 128
FC_HID = 128

# valid lengths through the network (conv k=5,s=1,p=1: T -> T-2 ; pool 2,2: floor(T/2))
T1C = L - 2             # 62  conv1 output
L1 = T1C // 2           # 31
T2C = L1 - 2            # 29  conv2 output
L2 = T2C // 2           # 14
T3C = L2 - 2            # 12  conv3 output
L3 = T3C // 2           # 6
FC1_IN = C3 * L3        # 768 (== MultiClassCNN.fc1_input_size)

# padded per-batch row counts carried inside the kernel (powers of two, >= valid length)
P0, P1, P2, P3 = 64, 32, 16, 8
# rows kept (non-zeroed) after each conv = 2*floor(Tconv/2); the zeroed tail rows double
# as the conv zero padding of the next layer (and, via circular roll, of the previous
# batch block's right side / next block's left side).
KEEP1, KEEP2, KEEP3 = 2 * L1, 2 * L2, 2 * L3      # 62, 28, 12

# --- static correctness guards for the padding-by-masking scheme (review concern #1) ---
assert KEEP1 < P0 and KEEP2 < P1 and KEEP3 < P2, "zeroed tail rows must exist pre-pool"
assert L1 < P1 and L2 < P2 and L3 < P3, "zero pad rows must survive pooling"
# furthest right-pad read of a kept output row must stay inside the batch block
assert KEEP2 + (K - 1 - PAD) <= P1 and KEEP3 + (K - 1 - PAD) <= P2


# ------------------------------- kernel helpers -----------------------------
def _mask_rows(y, period, keep):
    """Zero rows whose within-batch index (r % period) >= keep. `period` is a power of 2."""
    r = lax.broadcasted_iota(jnp.int32, y.shape, 0)
    return jnp.where(jnp.bitwise_and(r, period - 1) < keep, y, 0.0)


def _pool2(y):
    """MaxPool1d(kernel=2, stride=2) over merged rows (row count is even)."""
    R, C = y.shape
    yr = y.reshape(R // 2, 2, C)
    return jnp.maximum(yr[:, 0, :], yr[:, 1, :])


def _conv_relu(act, w_ref, b_ref):
    """One im2col conv: act (R, Cin) f32 -> relu(conv + bias) (R, Cout) f32 (unmasked).

    Output row t needs act rows t-1 .. t+3 (PyTorch pad=1).  Tap k is pltpu.roll of the
    activation by (1-k) mod R along sublanes (jnp.roll semantics: result[t] = act[t+k-1]).
    The circular wrap is safe because each batch block's tail rows are exactly zero
    (masked after the previous layer), so they provide both the left and right zero pads;
    wrapped garbage only feeds output rows the caller masks afterwards.
    """
    R, _ = act.shape
    taps = []
    for k in range(K):
        s = (1 - k) % R                               # non-negative static shift
        t = act if s == 0 else pltpu.roll(act, shift=s, axis=0)   # XLU, 32-bit sublane roll
        taps.append(t.astype(jnp.bfloat16))           # patch built in bf16 (half the traffic)
    patch = jnp.concatenate(taps, axis=1)             # (R, K*Cin) bf16
    y = jnp.dot(patch, w_ref[...], preferred_element_type=jnp.float32)   # MXU, f32 accum
    return jnp.maximum(y + b_ref[...], 0.0)           # f32 VPU path (portable to v5e)


def _forward_kernel(p1_ref, w1_ref, b1_ref, w2_ref, b2_ref, w3_ref, b3_ref,
                    fw1_ref, fb1_ref, fw2_ref, fb2_ref, out_ref):
    # ---- layer 1: conv1 patches prebuilt by the wrapper -> one (B*64, 8) @ (8, 32) matmul
    y1 = jnp.dot(p1_ref[...].astype(jnp.bfloat16), w1_ref[...],
                 preferred_element_type=jnp.float32)
    y1 = jnp.maximum(y1 + b1_ref[...], 0.0)
    a1 = _pool2(_mask_rows(y1, P0, KEEP1))            # (B*32, 32); per-batch rows >= 31 are 0

    # ---- layers 2 & 3: one im2col matmul each
    y2 = _conv_relu(a1, w2_ref, b2_ref)               # (B*32, 64)
    a2 = _pool2(_mask_rows(y2, P1, KEEP2))            # (B*16, 64); per-batch rows >= 14 are 0
    y3 = _conv_relu(a2, w3_ref, b3_ref)               # (B*16, 128)
    a3 = _pool2(_mask_rows(y3, P2, KEEP3))            # (B*8, 128); per-batch rows >= 6 are 0

    # ---- fc1: single (B, L3*C3) @ (L3*C3, 128) matmul.  The (B,6,128)->(B,768) flatten is
    # ~a dozen vregs of XLU work here, cheaper than 6 separate MXU push/pop groups, and on
    # v6e/v7x the 768-deep contraction fills the 256-deep MXU (Mosaic tiles it internally).
    Bb = a3.shape[0] // P3
    flat = a3.reshape(Bb, P3, C3)[:, :L3, :].reshape(Bb, L3 * C3)   # time-major (l*C3 + c)
    z = jnp.dot(flat.astype(jnp.bfloat16), fw1_ref[...],
                preferred_element_type=jnp.float32) + fb1_ref[...]
    z = jnp.maximum(z, 0.0)                           # (B, FC_HID)

    # ---- fc2 -> logits
    out_ref[...] = jnp.dot(z.astype(jnp.bfloat16), fw2_ref[...],
                           preferred_element_type=jnp.float32) + fb2_ref[...]


# ------------------------------- wrapper -------------------------------------
@functools.partial(jax.jit, static_argnames=("batch_tile",))
def multiclass_cnn_forward(x, kp, batch_tile=None):
    """x: (B, L) f32 -> logits (B, NUM_CLASSES) f32.

    batch_tile=None  -> single ungridded call (latency path, everything VMEM resident).
    batch_tile=BT    -> grid over B//BT batch tiles; weights are full blocks with constant
                        index_maps (DMA'd once, VMEM resident across grid steps) and the
                        grid axis is "parallel" so v7x's second TensorCore takes tiles.
                        Size BT per chip: ~128 on v7x (64 MiB VMEM), ~256 on v5e/v6e
                        (raise vmem_limit_bytes above the 32 MiB default); keep the number
                        of tiles even so no core idles on the tail.
    """
    Bb = x.shape[0]
    # conv1 im2col of the raw input (layout plumbing only; all FLOPs happen in the kernel).
    # Column k of row (b, t) holds x zero-padded-by-1 at position t+k; columns 5..7 hit
    # zero weight rows; rows t >= 62 are masked inside the kernel.
    xp = jnp.pad(x.astype(jnp.float32), ((0, 0), (PAD, PAD)))          # (B, L+2)
    idx = jnp.minimum(jnp.arange(P0)[:, None] + jnp.arange(KP)[None, :],
                      L + 2 * PAD - 1)
    patches = xp[:, idx].reshape(Bb * P0, KP)                          # (B*64, 8)

    args = (patches, kp["w1"], kp["b1"], kp["w2"], kp["b2"], kp["w3"], kp["b3"],
            kp["fw1"], kp["fb1"], kp["fw2"], kp["fb2"])
    out_shape = jax.ShapeDtypeStruct((Bb, NUM_CLASSES), jnp.float32)

    if batch_tile is None or batch_tile >= Bb:
        # Latency-optimal single call; all operands live in VMEM for the whole kernel.
        vmem = pl.BlockSpec(memory_space=pltpu.MemorySpace.VMEM)
        return pl.pallas_call(
            _forward_kernel,
            out_shape=out_shape,
            in_specs=[vmem] * len(args),
            out_specs=vmem,
        )(*args)

    assert Bb % batch_tile == 0, "batch must divide evenly into batch tiles"
    assert batch_tile % 8 == 0, "batch tile must be sublane aligned"
    grid = (Bb // batch_tile,)

    weight_specs = [pl.BlockSpec(a.shape, lambda i: (0, 0)) for a in args[1:]]  # resident
    in_specs = [pl.BlockSpec((batch_tile * P0, KP), lambda i: (i, 0))] + weight_specs
    out_specs = pl.BlockSpec((batch_tile, NUM_CLASSES), lambda i: (i, 0))
    return pl.pallas_call(
        _forward_kernel,
        out_shape=out_shape,
        grid=grid,
        in_specs=in_specs,
        out_specs=out_specs,
        compiler_params=pltpu.CompilerParams(
            dimension_semantics=("parallel",)),   # megacore / v7x 2nd TC takes tiles
    )(*args)


# ---------------------- parameters (deterministic, synthetic) ----------------------
def init_params(key):
    """f32 parameters with PyTorch-equivalent layouts:
       conv weight (K, Cin, Cout)  == torch (Cout, Cin, K).permute(2, 1, 0)
       fc weight   (in, out)       == torch weight.T  (fc1 'in' index = c*L3 + l, i.e.
                                      torch's channel-major flatten of the NCW tensor)
    """
    ks = jax.random.split(key, 10)
    s = 0.05
    nrm = lambda k, shape: s * jax.random.normal(k, shape, dtype=jnp.float32)
    return dict(
        w1=nrm(ks[0], (K, 1, C1)),        b1=nrm(ks[1], (C1,)),
        w2=nrm(ks[2], (K, C1, C2)),       b2=nrm(ks[3], (C2,)),
        w3=nrm(ks[4], (K, C2, C3)),       b3=nrm(ks[5], (C3,)),
        fw1=nrm(ks[6], (FC1_IN, FC_HID)), fb1=nrm(ks[7], (FC_HID,)),
        fw2=nrm(ks[8], (FC_HID, NUM_CLASSES)), fb2=nrm(ks[9], (NUM_CLASSES,)),
    )


def prepare_kernel_params(p):
    """One-time host-side prep (what you'd do once when loading a torch checkpoint):
       * conv weights -> im2col layout (K*Cin, Cout), bf16 (conv1 zero-padded to 8 rows),
       * fc1 weight re-ordered from torch's c*L3+l flatten to time-major l*C3+c, (768,128),
       * biases as f32 (1, C) rows; fc weights bf16.
    fw1 weight-only compression (int8 + per-column scale on v5e/v6e, fp8 e4m3 on v7x) would
    halve the dominant HBM bytes but changes the module's numerics, so it is left out here.
    """
    bf = jnp.bfloat16
    w1 = jnp.pad(p["w1"].reshape(K, C1), ((0, KP - K), (0, 0)))
    fw1 = (p["fw1"].reshape(C3, L3, FC_HID).transpose(1, 0, 2)   # (L3, C3, FC_HID)
           .reshape(L3 * C3, FC_HID))                            # row index = l*C3 + c
    return dict(
        w1=w1.astype(bf),                          b1=p["b1"].reshape(1, C1),
        w2=p["w2"].reshape(K * C1, C2).astype(bf), b2=p["b2"].reshape(1, C2),
        w3=p["w3"].reshape(K * C2, C3).astype(bf), b3=p["b3"].reshape(1, C3),
        fw1=fw1.astype(bf),                        fb1=p["fb1"].reshape(1, FC_HID),
        fw2=p["fw2"].astype(bf),                   fb2=p["fb2"].reshape(1, NUM_CLASSES),
    )


# -------------------- pure-JAX f32 reference (PyTorch semantics) --------------------
def reference_forward(x, p):
    def conv_relu_pool(h, w, b):
        Bb, T, Cin = h.shape
        Cout = w.shape[2]
        Tc = T + 2 * PAD - K + 1
        hp = jnp.pad(h, ((0, 0), (PAD, PAD), (0, 0)))
        out = b.reshape(1, 1, Cout)
        for k in range(K):
            out = out + jnp.einsum("btc,co->bto", hp[:, k:k + Tc, :], w[k])
        out = jnp.maximum(out, 0.0)
        H = Tc // 2
        return out[:, :2 * H, :].reshape(Bb, H, 2, Cout).max(axis=2)

    h = x[:, :, None].astype(jnp.float32)                       # NWC
    h = conv_relu_pool(h, p["w1"], p["b1"])
    h = conv_relu_pool(h, p["w2"], p["b2"])
    h = conv_relu_pool(h, p["w3"], p["b3"])                     # (B, L3, C3)
    flat = jnp.transpose(h, (0, 2, 1)).reshape(h.shape[0], -1)  # torch NCW flatten (c*L3+l)
    z = jnp.maximum(flat @ p["fw1"] + p["fb1"], 0.0)
    return z @ p["fw2"] + p["fb2"]


if __name__ == "__main__":
    key = jax.random.PRNGKey(0)
    pkey, xkey, xkey2 = jax.random.split(key, 3)
    params = init_params(pkey)
    kparams = prepare_kernel_params(params)

    # ---- latency path: B=2, single ungridded call
    x = jax.random.normal(xkey, (B, L), dtype=jnp.float32)
    out = jax.block_until_ready(multiclass_cnn_forward(x, kparams))
    assert out.shape == (B, NUM_CLASSES)
    ref = reference_forward(x, params)
    # bf16 matmul operands (f32 accumulation) vs. the all-f32 reference at 0.05-scale
    # synthetic weights; re-validate tolerance before reusing with real checkpoints.
    assert jnp.allclose(out, ref, rtol=2e-2, atol=2e-3), (out, ref)

    # ---- throughput path: batch grid (2 tiles of 8), weights VMEM-resident across tiles
    xb = jax.random.normal(xkey2, (16, L), dtype=jnp.float32)
    outb = jax.block_until_ready(multiclass_cnn_forward(xb, kparams, batch_tile=8))
    refb = reference_forward(xb, params)
    assert jnp.allclose(outb, refb, rtol=2e-2, atol=2e-3), (outb, refb)

    print("KERNEL_OK")
</pallas_src>

<mosaic_0001>
module attributes {stable_mosaic.version = 11 : i64} {
  func.func @_forward_kernel(%arg0: memref<128x8xf32, #tpu.memory_space<vmem>>, %arg1: memref<8x32xbf16, #tpu.memory_space<vmem>>, %arg2: memref<1x32xf32, #tpu.memory_space<vmem>>, %arg3: memref<160x64xbf16, #tpu.memory_space<vmem>>, %arg4: memref<1x64xf32, #tpu.memory_space<vmem>>, %arg5: memref<320x128xbf16, #tpu.memory_space<vmem>>, %arg6: memref<1x128xf32, #tpu.memory_space<vmem>>, %arg7: memref<768x128xbf16, #tpu.memory_space<vmem>>, %arg8: memref<1x128xf32, #tpu.memory_space<vmem>>, %arg9: memref<128x8xbf16, #tpu.memory_space<vmem>>, %arg10: memref<1x8xf32, #tpu.memory_space<vmem>>, %arg11: memref<2x8xf32, #tpu.memory_space<vmem>>) attributes {dimension_semantics = [], scalar_prefetch = 0 : i64, scratch_operands = 0 : i64, tpu.core_type = #tpu.core_type<tc>} {
    %c0 = arith.constant 0 : index
    %c0_0 = arith.constant 0 : index
    %0 = vector.load %arg0[%c0, %c0_0] : memref<128x8xf32, #tpu.memory_space<vmem>>, vector<128x8xf32>
    %1 = arith.truncf %0 : vector<128x8xf32> to vector<128x8xbf16>
    %c0_1 = arith.constant 0 : index
    %c0_2 = arith.constant 0 : index
    %2 = vector.load %arg1[%c0_1, %c0_2] : memref<8x32xbf16, #tpu.memory_space<vmem>>, vector<8x32xbf16>
    %cst = arith.constant dense<0.000000e+00> : vector<128x32xf32>
    %3 = tpu.matmul %1, %2, %cst {dimension_numbers = #tpu.dot_dimension_numbers<[1], [0], [0], [1], [0, 0, 1, 1], [], []>} : vector<128x8xbf16>, vector<8x32xbf16>, vector<128x32xf32> -> vector<128x32xf32>
    %c0_3 = arith.constant 0 : index
    %c0_4 = arith.constant 0 : index
    %4 = vector.load %arg2[%c0_3, %c0_4] : memref<1x32xf32, #tpu.memory_space<vmem>>, vector<1x32xf32>
    %5 = vector.broadcast %4 : vector<1x32xf32> to vector<128x32xf32>
    %6 = arith.addf %3, %5 : vector<128x32xf32>
    %cst_5 = arith.constant 0.000000e+00 : f32
    %7 = vector.broadcast %cst_5 : f32 to vector<128x32xf32>
    %8 = arith.maximumf %6, %7 : vector<128x32xf32>
    %9 = tpu.iota {dimensions = array<i32: 0>} : vector<128x32xi32>
    %c63_i32 = arith.constant 63 : i32
    %10 = vector.broadcast %c63_i32 : i32 to vector<128x32xi32>
    %11 = arith.andi %9, %10 : vector<128x32xi32>
    %c62_i32 = arith.constant 62 : i32
    %12 = vector.broadcast %c62_i32 : i32 to vector<128x32xi32>
    %13 = arith.cmpi slt, %11, %12 : vector<128x32xi32>
    %cst_6 = arith.constant 0.000000e+00 : f32
    %14 = vector.broadcast %cst_6 : f32 to vector<128x32xf32>
    %15 = arith.select %13, %8, %14 : vector<128x32xi1>, vector<128x32xf32>
    %16 = vector.shape_cast %15 : vector<128x32xf32> to vector<64x2x32xf32>
    %17 = vector.extract_strided_slice %16 {offsets = [0, 0, 0], sizes = [64, 1, 32], strides = [1, 1, 1]} : vector<64x2x32xf32> to vector<64x1x32xf32>
    %18 = vector.shape_cast %17 : vector<64x1x32xf32> to vector<64x32xf32>
    %19 = vector.extract_strided_slice %16 {offsets = [0, 1, 0], sizes = [64, 1, 32], strides = [1, 1, 1]} : vector<64x2x32xf32> to vector<64x1x32xf32>
    %20 = vector.shape_cast %19 : vector<64x1x32xf32> to vector<64x32xf32>
    %21 = arith.maximumf %18, %20 : vector<64x32xf32>
    %c1_i32 = arith.constant 1 : i32
    %22 = tpu.dynamic_rotate %21 by %c1_i32 dim 0 : vector<64x32xf32>, i32 -> vector<64x32xf32>
    %23 = arith.truncf %22 : vector<64x32xf32> to vector<64x32xbf16>
    %24 = arith.truncf %21 : vector<64x32xf32> to vector<64x32xbf16>
    %c63_i32_7 = arith.constant 63 : i32
    %25 = tpu.dynamic_rotate %21 by %c63_i32_7 dim 0 : vector<64x32xf32>, i32 -> vector<64x32xf32>
    %26 = arith.truncf %25 : vector<64x32xf32> to vector<64x32xbf16>
    %c62_i32_8 = arith.constant 62 : i32
    %27 = tpu.dynamic_rotate %21 by %c62_i32_8 dim 0 : vector<64x32xf32>, i32 -> vector<64x32xf32>
    %28 = arith.truncf %27 : vector<64x32xf32> to vector<64x32xbf16>
    %c61_i32 = arith.constant 61 : i32
    %29 = tpu.dynamic_rotate %21 by %c61_i32 dim 0 : vector<64x32xf32>, i32 -> vector<64x32xf32>
    %30 = arith.truncf %29 : vector<64x32xf32> to vector<64x32xbf16>
    %31 = tpu.concatenate %23, %24, %26, %28, %30 in 1 : vector<64x32xbf16>, vector<64x32xbf16>, vector<64x32xbf16>, vector<64x32xbf16>, vector<64x32xbf16> -> vector<64x160xbf16>
    %c0_9 = arith.constant 0 : index
    %c0_10 = arith.constant 0 : index
    %32 = vector.load %arg3[%c0_9, %c0_10] : memref<160x64xbf16, #tpu.memory_space<vmem>>, vector<160x64xbf16>
    %cst_11 = arith.constant dense<0.000000e+00> : vector<64x64xf32>
    %33 = tpu.matmul %31, %32, %cst_11 {dimension_numbers = #tpu.dot_dimension_numbers<[1], [0], [0], [1], [0, 0, 1, 1], [], []>} : vector<64x160xbf16>, vector<160x64xbf16>, vector<64x64xf32> -> vector<64x64xf32>
    %c0_12 = arith.constant 0 : index
    %c0_13 = arith.constant 0 : index
    %34 = vector.load %arg4[%c0_12, %c0_13] : memref<1x64xf32, #tpu.memory_space<vmem>>, vector<1x64xf32>
    %35 = vector.broadcast %34 : vector<1x64xf32> to vector<64x64xf32>
    %36 = arith.addf %33, %35 : vector<64x64xf32>
    %cst_14 = arith.constant 0.000000e+00 : f32
    %37 = vector.broadcast %cst_14 : f32 to vector<64x64xf32>
    %38 = arith.maximumf %36, %37 : vector<64x64xf32>
    %39 = tpu.iota {dimensions = array<i32: 0>} : vector<64x64xi32>
    %c31_i32 = arith.constant 31 : i32
    %40 = vector.broadcast %c31_i32 : i32 to vector<64x64xi32>
    %41 = arith.andi %39, %40 : vector<64x64xi32>
    %c28_i32 = arith.constant 28 : i32
    %42 = vector.broadcast %c28_i32 : i32 to vector<64x64xi32>
    %43 = arith.cmpi slt, %41, %42 : vector<64x64xi32>
    %cst_15 = arith.constant 0.000000e+00 : f32
    %44 = vector.broadcast %cst_15 : f32 to vector<64x64xf32>
    %45 = arith.select %43, %38, %44 : vector<64x64xi1>, vector<64x64xf32>
    %46 = vector.shape_cast %45 : vector<64x64xf32> to vector<32x2x64xf32>
    %47 = vector.extract_strided_slice %46 {offsets = [0, 0, 0], sizes = [32, 1, 64], strides = [1, 1, 1]} : vector<32x2x64xf32> to vector<32x1x64xf32>
    %48 = vector.shape_cast %47 : vector<32x1x64xf32> to vector<32x64xf32>
    %49 = vector.extract_strided_slice %46 {offsets = [0, 1, 0], sizes = [32, 1, 64], strides = [1, 1, 1]} : vector<32x2x64xf32> to vector<32x1x64xf32>
    %50 = vector.shape_cast %49 : vector<32x1x64xf32> to vector<32x64xf32>
    %51 = arith.maximumf %48, %50 : vector<32x64xf32>
    %c1_i32_16 = arith.constant 1 : i32
    %52 = tpu.dynamic_rotate %51 by %c1_i32_16 dim 0 : vector<32x64xf32>, i32 -> vector<32x64xf32>
    %53 = arith.truncf %52 : vector<32x64xf32> to vector<32x64xbf16>
    %54 = arith.truncf %51 : vector<32x64xf32> to vector<32x64xbf16>
    %c31_i32_17 = arith.constant 31 : i32
    %55 = tpu.dynamic_rotate %51 by %c31_i32_17 dim 0 : vector<32x64xf32>, i32 -> vector<32x64xf32>
    %56 = arith.truncf %55 : vector<32x64xf32> to vector<32x64xbf16>
    %c30_i32 = arith.constant 30 : i32
    %57 = tpu.dynamic_rotate %51 by %c30_i32 dim 0 : vector<32x64xf32>, i32 -> vector<32x64xf32>
    %58 = arith.truncf %57 : vector<32x64xf32> to vector<32x64xbf16>
    %c29_i32 = arith.constant 29 : i32
    %59 = tpu.dynamic_rotate %51 by %c29_i32 dim 0 : vector<32x64xf32>, i32 -> vector<32x64xf32>
    %60 = arith.truncf %59 : vector<32x64xf32> to vector<32x64xbf16>
    %61 = tpu.concatenate %53, %54, %56, %58, %60 in 1 : vector<32x64xbf16>, vector<32x64xbf16>, vector<32x64xbf16>, vector<32x64xbf16>, vector<32x64xbf16> -> vector<32x320xbf16>
    %c0_18 = arith.constant 0 : index
    %c0_19 = arith.constant 0 : index
    %62 = vector.load %arg5[%c0_18, %c0_19] : memref<320x128xbf16, #tpu.memory_space<vmem>>, vector<320x128xbf16>
    %cst_20 = arith.constant dense<0.000000e+00> : vector<32x128xf32>
    %63 = tpu.matmul %61, %62, %cst_20 {dimension_numbers = #tpu.dot_dimension_numbers<[1], [0], [0], [1], [0, 0, 1, 1], [], []>} : vector<32x320xbf16>, vector<320x128xbf16>, vector<32x128xf32> -> vector<32x128xf32>
    %c0_21 = arith.constant 0 : index
    %c0_22 = arith.constant 0 : index
    %64 = vector.load %arg6[%c0_21, %c0_22] : memref<1x128xf32, #tpu.memory_space<vmem>>, vector<1x128xf32>
    %65 = vector.broadcast %64 : vector<1x128xf32> to vector<32x128xf32>
    %66 = arith.addf %63, %65 : vector<32x128xf32>
    %cst_23 = arith.constant 0.000000e+00 : f32
    %67 = vector.broadcast %cst_23 : f32 to vector<32x128xf32>
    %68 = arith.maximumf %66, %67 : vector<32x128xf32>
    %69 = tpu.iota {dimensions = array<i32: 0>} : vector<32x128xi32>
    %c15_i32 = arith.constant 15 : i32
    %70 = vector.broadcast %c15_i32 : i32 to vector<32x128xi32>
    %71 = arith.andi %69, %70 : vector<32x128xi32>
    %c12_i32 = arith.constant 12 : i32
    %72 = vector.broadcast %c12_i32 : i32 to vector<32x128xi32>
    %73 = arith.cmpi slt, %71, %72 : vector<32x128xi32>
    %cst_24 = arith.constant 0.000000e+00 : f32
    %74 = vector.broadcast %cst_24 : f32 to vector<32x128xf32>
    %75 = arith.select %73, %68, %74 : vector<32x128xi1>, vector<32x128xf32>
    %76 = vector.shape_cast %75 : vector<32x128xf32> to vector<16x2x128xf32>
    %77 = vector.extract_strided_slice %76 {offsets = [0, 0, 0], sizes = [16, 1, 128], strides = [1, 1, 1]} : vector<16x2x128xf32> to vector<16x1x128xf32>
    %78 = vector.shape_cast %77 : vector<16x1x128xf32> to vector<16x128xf32>
    %79 = vector.extract_strided_slice %76 {offsets = [0, 1, 0], sizes = [16, 1, 128], strides = [1, 1, 1]} : vector<16x2x128xf32> to vector<16x1x128xf32>
    %80 = vector.shape_cast %79 : vector<16x1x128xf32> to vector<16x128xf32>
    %81 = arith.maximumf %78, %80 : vector<16x128xf32>
    %82 = vector.shape_cast %81 : vector<16x128xf32> to vector<2x8x128xf32>
    %83 = vector.extract_strided_slice %82 {offsets = [0, 0, 0], sizes = [2, 6, 128], strides = [1, 1, 1]} : vector<2x8x128xf32> to vector<2x6x128xf32>
    %84 = vector.shape_cast %83 : vector<2x6x128xf32> to vector<2x768xf32>
    %85 = arith.truncf %84 : vector<2x768xf32> to vector<2x768xbf16>
    %c0_25 = arith.constant 0 : index
    %c0_26 = arith.constant 0 : index
    %86 = vector.load %arg7[%c0_25, %c0_26] : memref<768x128xbf16, #tpu.memory_space<vmem>>, vector<768x128xbf16>
    %cst_27 = arith.constant dense<0.000000e+00> : vector<2x128xf32>
    %87 = tpu.matmul %85, %86, %cst_27 {dimension_numbers = #tpu.dot_dimension_numbers<[1], [0], [0], [1], [0, 0, 1, 1], [], []>} : vector<2x768xbf16>, vector<768x128xbf16>, vector<2x128xf32> -> vector<2x128xf32>
    %c0_28 = arith.constant 0 : index
    %c0_29 = arith.constant 0 : index
    %88 = vector.load %arg8[%c0_28, %c0_29] : memref<1x128xf32, #tpu.memory_space<vmem>>, vector<1x128xf32>
    %89 = vector.broadcast %88 : vector<1x128xf32> to vector<2x128xf32>
    %90 = arith.addf %87, %89 : vector<2x128xf32>
    %cst_30 = arith.constant 0.000000e+00 : f32
    %91 = vector.broadcast %cst_30 : f32 to vector<2x128xf32>
    %92 = arith.maximumf %90, %91 : vector<2x128xf32>
    %93 = arith.truncf %92 : vector<2x128xf32> to vector<2x128xbf16>
    %c0_31 = arith.constant 0 : index
    %c0_32 = arith.constant 0 : index
    %94 = vector.load %arg9[%c0_31, %c0_32] : memref<128x8xbf16, #tpu.memory_space<vmem>>, vector<128x8xbf16>
    %cst_33 = arith.constant dense<0.000000e+00> : vector<2x8xf32>
    %95 = tpu.matmul %93, %94, %cst_33 {dimension_numbers = #tpu.dot_dimension_numbers<[1], [0], [0], [1], [0, 0, 1, 1], [], []>} : vector<2x128xbf16>, vector<128x8xbf16>, vector<2x8xf32> -> vector<2x8xf32>
    %c0_34 = arith.constant 0 : index
    %c0_35 = arith.constant 0 : index
    %96 = vector.load %arg10[%c0_34, %c0_35] : memref<1x8xf32, #tpu.memory_space<vmem>>, vector<1x8xf32>
    %97 = vector.broadcast %96 : vector<1x8xf32> to vector<2x8xf32>
    %98 = arith.addf %95, %97 : vector<2x8xf32>
    %c0_36 = arith.constant 0 : index
    %c0_37 = arith.constant 0 : index
    %99 = vector.load %arg11[%c0_36, %c0_37] : memref<2x8xf32, #tpu.memory_space<vmem>>, vector<2x8xf32>
    tpu.vector_store %arg11[%c0_36, %c0_37], %98 {strides = array<i32>} : memref<2x8xf32, #tpu.memory_space<vmem>>, vector<2x8xf32>,
    return
  }
}

</mosaic_0001>

<bundles_post_ra>
// kernel: multiclass_cnn_forward.1
= control target key start
LH: loop header
LB: loop body
LE: loop exit
PB: predicated region body
PF: predicated region fallthrough
CT: control target
= control target key end

     0   :  { %vm97_vm0 = vcmask 1043456   ;;  %vm72_vm1 = vcmask 64512   ;;  %s5971_s0 = inlined_call_operand.vmem [shape: f32[128,8], index: 0, kind: input, shape index: {}]   ;;  %s5972_s1 = inlined_call_operand.vmem [shape: bf16[8,32], index: 1, kind: input, shape index: {}]   ;;  %s5973_s2 = inlined_call_operand.vmem [shape: f32[1,32], index: 2, kind: input, shape index: {}]   ;;  %s5974_s3 = inlined_call_operand.vmem [shape: bf16[160,64], index: 3, kind: input, shape index: {}]   ;;  %s5975_s4 = inlined_call_operand.vmem [shape: f32[1,64], index: 4, kind: input, shape index: {}]   ;;  %s5976_s5 = inlined_call_operand.vmem [shape: bf16[320,128], index: 5, kind: input, shape index: {}]   ;;  %s5977_s6 = inlined_call_operand.vmem [shape: f32[1,128], index: 6, kind: input, shape index: {}]   ;;  %s5978_s7 = inlined_call_operand.vmem [shape: bf16[768,128], index: 7, kind: input, shape index: {}]   ;;  %s5979_s8 = inlined_call_operand.vmem [shape: f32[1,128], index: 8, kind: input, shape index: {}]   ;;  %s5980_s9 = inlined_call_operand.vmem [shape: bf16[128,8], index: 9, kind: input, shape index: {}]   ;;  %s5981_s10 = inlined_call_operand.vmem [shape: f32[1,8], index: 10, kind: input, shape index: {}]   ;;  %s5982_s11 = inlined_call_operand.hbm [shape: f32[2,8], index: 11, kind: output, shape index: {}]  }
   0x1   :  { %v64_v0 = vld [vmem:[%s5972_s1] sm:$0xf]  ;;  %v41_v2 = vld [vmem:[%s5971_s0 + $0x8] sm:$0xff]  ;;  %v42_v5 = vld [vmem:[%s5971_s0 + $0x10] sm:$0xff] }
   0x2   :  { %v40_v1 = vld [vmem:[%s5971_s0] sm:$0xff]  ;;  %4164 = vmatprep.subr.msk.bf16.mxu1 %vm97_vm0, %v64_v0  ;;  %v99_v3 = vsel %vm97_vm0, %v64_v0, 0  ;;  %v43_v6 = vld [vmem:[%s5971_s0 + $0x18] sm:$0xff]  ;;  %v45_v9 = vld [vmem:[%s5971_s0 + $0x28] sm:$0xff] }
   0x3   :  { %v56_v4 = vpack.c.bf16 %v41_v2, %v40_v1  ;;  %v44_v7 = vld [vmem:[%s5971_s0 + $0x20] sm:$0xff]  ;;  %4115 = vmatpush3.bf16.msra.mxu1 %v99_v3  ;;  %v57_v8 = vpack.c.bf16 %v43_v6, %v42_v5  ;;  %v46_v11 = vld [vmem:[%s5971_s0 + $0x30] sm:$0xff]  ;;  %v47_v12 = vld [vmem:[%s5971_s0 + $0x38] sm:$0xff] }
   0x4   :  { %v58_v10 = vpack.c.bf16 %v45_v9, %v44_v7  ;;  %v48_v13 = vld [vmem:[%s5971_s0 + $0x40] sm:$0xff]  ;;  %v49_v14 = vld [vmem:[%s5971_s0 + $0x48] sm:$0xff]  ;;  %v59_v15 = vpack.c.bf16 %v47_v12, %v46_v11  ;;  %v50_v17 = vld [vmem:[%s5971_s0 + $0x50] sm:$0xff] }
   0x5   :  { %4116 = vmatprep.mubr.msk.bf16.mxu1 %vm72_vm1, %v56_v4  ;;  %v60_v16 = vpack.c.bf16 %v49_v14, %v48_v13  ;;  %v51_v18 = vld [vmem:[%s5971_s0 + $0x58] sm:$0xff]  ;;  %v52_v19 = vld [vmem:[%s5971_s0 + $0x60] sm:$0xff]  ;;  %v53_v20 = vld [vmem:[%s5971_s0 + $0x68] sm:$0xff] }
   0x6   :  { %4117 = vmatmul.mubr.msk.bf16.vlgmr.msra.gmra.mrb[0].mxu1 %vm72_vm1, %v57_v8  ;;  %v61_v21 = vpack.c.bf16 %v51_v18, %v50_v17  ;;  %v62_v22 = vpack.c.bf16 %v53_v20, %v52_v19  ;;  %v54_v23 = vld [vmem:[%s5971_s0 + $0x70] sm:$0xff]  ;;  %v55_v24 = vld [vmem:[%s5971_s0 + $0x78] sm:$0xff] }
   0x7   :  { %4120 = vmatprep.mubr.msk.bf16.mxu1 %vm72_vm1, %v58_v10  ;;  %v63_v25 = vpack.c.bf16 %v55_v24, %v54_v23 }
   0xe   :  { %4121 = vmatmul.mubr.msk.bf16.gmra.mrb[4].mxu1 %vm72_vm1, %v59_v15 }
   0xf   :  { %4124 = vmatprep.mubr.msk.bf16.mxu1 %vm72_vm1, %v60_v16 }
  0x16   :  { %4125 = vmatmul.mubr.msk.bf16.gmra.mrb[8].mxu1 %vm72_vm1, %v61_v21 }
  0x17   :  { %4128 = vmatprep.mubr.msk.bf16.mxu1 %vm72_vm1, %v62_v22 }
  0x1e   :  { %4129 = vmatmul.mubr.msk.bf16.gmra.mrb[12].mxu1 %vm72_vm1, %v63_v25 }
  0x1f   :  { %16 = vsyncpa [#allocation3], 0  ;;  %v214_v26 = vlaneseq  ;;  %v4284_v27 = vmov 1983009808   ;;  %v4417_v31 = vld [vmem:[%s5973_s2] ss:$0 sm:$0xff] }
  0x20   :  { %v297_v28 = vunpack.c.l.s4 %v4284_v27  ;;  %vm1207_vm2 = vcmask 1041409   ;;  %vm1209_vm3 = vcmask 1042434   ;;  %vm1211_vm4 = vcmask 1043459   ;;  %s4285_s0 = smov 32   ;;  %s4286_s2 = smov 96  }
  0x21   :  { %v4412_v29 = vshrl.u32 %v214_v26, 7  ;;  %vm1213_vm5 = vcmask 1044484   ;;  %vm1215_vm6 = vcmask 1045509   ;;  %vm1217_vm7 = vcmask 1046534   ;;  %s4287_s13 = smov 64   ;;  %s4292_s19 = smov [#allocation2]  }
  0x22   :  { %v298_v30 = vunpack.c.0.s8 %v297_v28  ;;  %vm1219_vm10 = vcmask 1047559   ;;  %vm1702_vm12 = vcmask 261120   ;;  %vm1715_vm0 = vcmask 523264   ;;  %s3775_s20 = sshll.u32 %s4292_s19, 4  ;;  %s3776_s20 = int_to_ptr.vmem [resolvable:$true] %s3775_s20 }
  0x23   :  { %v4424_v36 = vadd.s32 56, %v4412_v29  ;;  %v4428_v39 = vadd.s32 120, %v4412_v29  ;;  %v4432_v43 = vsub.s32 0, %v4412_v29  ;;  %vm1413_vm11 = vcmp.lt.s32.totalorder %v4412_v29, 5  ;;  %s4260_s21 = scalar_lea.vmem %s3776_s20, 32  ;;  %p4265_p1 = scmp.lt.s32.totalorder %s3776_s20, %s3776_s20 }
  0x24   :  { %v4421_v34 = vsub.s32 %v298_v30, %v4412_v29  ;;  %vm1392_vm13 = vcmp.lt.s32.totalorder %v4412_v29, 6  ;;  %vm1371_vm14 = vcmp.lt.s32.totalorder %v4412_v29, 7  ;;  %vm1286_vm15 = vcmp.lt.s32.totalorder %v4412_v29, 1  ;;  %p4261_p0 = scmp.ne.s32.totalorder %s3776_s20, %s4260_s21  ;;  %p4266_p2 = scmp.lt.s32.totalorder %s4260_s21, %s4260_s21 }
  0x25   :  { %6000 = vst [vmem:[#allocation5_spill] sm:$0xff] %v4424_v36  ;;  %v238_v49 = vand.u32 63, %v4424_v36  ;;  %vm1724_vm1 = vcmask 785408  }
  0x26   :  { %p4267_p3 = por %p4266_p2, %p4265_p1 }
  0x27   :  { %vm4528_vm8 = vcmp.lt.s32.totalorder %v238_v49, 62 }
  0x28   :  { %p4268_p4 = pnand %p4267_p3, %p4261_p0 }
  0xd9   :  { %v4118_v32 = vpop.f32.mrb[0].mxu1 }
  0xda   :  { %v144_v33 = vadd.f32 %v4118_v32, %v4417_v31  ;;  %v135_v35 = vpop.f32.mrb[1].mxu1 }
  0xdb   :  { %v136_v37 = vadd.f32 %v4417_v31, %v135_v35  ;;  %v4119_v38 = vpop.f32.mrb[2].mxu1 }
  0xdc   :  { %v200_v40 = vmax.f32 %v144_v33, 0.0  ;;  %v147_v41 = vadd.f32 %v4119_v38, %v4417_v31  ;;  %v138_v42 = vpop.f32.mrb[3].mxu1 }
  0xdd   :  { %v198_v44 = vmax.f32 %v136_v37, 0.0  ;;  %v139_v45 = vadd.f32 %v4417_v31, %v138_v42 }
  0xde   :  { %v329_v46 = vcombine.high %v200_v40, %v200_v40  ;;  %v336_v47 = vrot.slane %v200_v40, %v4421_v34  ;;  %v4436_v48 = vmax.f32 %v147_v41, 0.0 }
  0xdf   :  { %v295_v50 = vcombine.high %v198_v44, %v198_v44  ;;  %v302_v51 = vrot.slane %v198_v44, %v4421_v34  ;;  %v4440_v52 = vmax.f32 %v139_v45, 0.0 }
  0xe0   :  { %v343_v54 = vrot.slane %v329_v46, %v4421_v34  ;;  %v344_v55 = vcombine.high %v336_v47, %v336_v47  ;;  %v3800_v56 = vrot.slane %v336_v47, 9  ;;  %v346_v57 = vcombine.high %v4436_v48, %v4436_v48 }
  0xe1   :  { %v309_v58 = vrot.slane %v295_v50, %v4421_v34  ;;  %v310_v59 = vcombine.high %v302_v51, %v302_v51  ;;  %v3792_v60 = vrot.slane %v302_v51, 9  ;;  %v4449_v61 = vrot.slane %v4436_v48, %v4421_v34  ;;  %v4451_v62 = vpop.f32.mrb[4].mxu1 }
  0xe2   :  { %v345_v63 = vcombine.high %v343_v54, %v343_v54  ;;  %v3801_v0 = vrot.slane %v344_v55, 9  ;;  %v3802_v1 = vrot.slane %v343_v54, 9  ;;  %v831_v2 = vmax.f32 %v336_v47, %v3800_v56  ;;  %v4453_v3 = vpop.f32.mrb[5].mxu1 }
  0xe3   :  { %v311_v4 = vcombine.high %v309_v58, %v309_v58  ;;  %v3793_v5 = vrot.slane %v310_v59, 9  ;;  %v3794_v6 = vrot.slane %v309_v58, 9  ;;  %v823_v7 = vmax.f32 %v302_v51, %v3792_v60  ;;  %v4455_v8 = vpop.f32.mrb[6].mxu1 }
  0xe4   :  { %v3803_v9 = vrot.slane %v345_v63, 9  ;;  %v832_v10 = vmax.f32 %v344_v55, %v3801_v0  ;;  %v833_v11 = vmax.f32 %v343_v54, %v3802_v1  ;;  %v986_v12 = vrot.slane %v831_v2, %v4432_v43  ;;  %v4458_v13 = vpop.f32.mrb[7].mxu1 }
  0xe5   :  { %v1307_v14 = vpack.c.bf16 %v831_v2, %v831_v2  ;;  %v3795_v15 = vrot.slane %v311_v4, 9  ;;  %v824_v16 = vmax.f32 %v310_v59, %v3793_v5  ;;  %v825_v17 = vmax.f32 %v309_v58, %v3794_v6 }
  0xe6   :  { %v834_v18 = vmax.f32 %v345_v63, %v3803_v9  ;;  %v990_v19 = vrot.slane %v832_v10, %v4432_v43  ;;  %v994_v20 = vrot.slane %v833_v11, %v4432_v43  ;;  %v1308_v21 = vpack.c.bf16 %v832_v10, %v832_v10 }
  0xe7   :  { %v1309_v22 = vpack.c.bf16 %v833_v11, %v833_v11  ;;  %v1498_v23 = vunpack.c.l.b16 %v1307_v14  ;;  %v826_v24 = vmax.f32 %v311_v4, %v3795_v15  ;;  %v954_v25 = vrot.slane %v823_v7, %v4432_v43 }
  0xe8   :  { %v998_v26 = vrot.slane %v834_v18, %v4432_v43  ;;  %v1221_v27 = vsel %vm1207_vm2, %v990_v19, %v986_v12  ;;  %v1310_v28 = vpack.c.bf16 %v834_v18, %v834_v18  ;;  %v1499_v30 = vunpack.c.l.b16 %v1308_v21 }
  0xe9   :  { %v1222_v32 = vsel %vm1209_vm3, %v994_v20, %v1221_v27  ;;  %v4466_v33 = vunpack.c.l.b16 %v1309_v22  ;;  %v958_v35 = vrot.slane %v824_v16, %v4432_v43  ;;  %v962_v37 = vrot.slane %v825_v17, %v4432_v43  ;;  %v4470_v38 = vpop.f32.mrb[8].mxu1 }
  0xea   :  { %v4472_v40 = vunpack.c.l.b16 %v1310_v28  ;;  %v1568_v41 = vrot.slane %v1499_v30, 7  ;;  %v966_v42 = vrot.slane %v826_v24, %v4432_v43  ;;  %v1299_v44 = vpack.c.bf16 %v823_v7, %v823_v7  ;;  %v4475_v45 = vpop.f32.mrb[9].mxu1 }
  0xeb   :  { %v1208_v47 = vsel %vm1207_vm2, %v958_v35, %v954_v25  ;;  %v1300_v50 = vpack.c.bf16 %v824_v16, %v824_v16  ;;  %v1301_v51 = vpack.c.bf16 %v825_v17, %v825_v17  ;;  %v4479_v54 = vpop.f32.mrb[10].mxu1  ;;  %v1302_v59 = vpack.c.bf16 %v826_v24, %v826_v24 }
  0xec   :  { %v4482_v55 = vsel %vm1207_vm2, %v1568_v41, %v1498_v23  ;;  %v1210_v58 = vsel %vm1209_vm3, %v962_v37, %v1208_v47  ;;  %v4486_v60 = vpop.f32.mrb[11].mxu1  ;;  %v1490_v63 = vunpack.c.l.b16 %v1299_v44  ;;  %v360_v2 = vrot.slane %v346_v57, %v4421_v34 }
  0xed   :  { %v1491_v0 = vunpack.c.l.b16 %v1300_v50  ;;  %v4488_v1 = vunpack.c.l.b16 %v1301_v51  ;;  %v4494_v4 = vunpack.c.l.b16 %v1302_v59  ;;  %v361_v5 = vcombine.high %v4449_v61, %v4449_v61 }
  0xee   :  { %v3804_v6 = vrot.slane %v4449_v61, 9  ;;  %v1223_v7 = vsel %vm1211_vm4, %v998_v26, %v1222_v32  ;;  %v4501_v11 = vcombine.high %v360_v2, %v360_v2  ;;  %v3806_v12 = vrot.slane %v360_v2, 9 }
  0xef   :  { %v1554_v9 = vrot.slane %v1491_v0, 7  ;;  %v3805_v15 = vrot.slane %v361_v5, 9  ;;  %v312_v57 = vcombine.high %v4440_v52, %v4440_v52  ;;  %v319_v19 = vrot.slane %v4440_v52, %v4421_v34 }
  0xf0   :  { %v835_v48 = vmax.f32 %v4449_v61, %v3804_v6  ;;  %v4511_v18 = vmax.f32 %v360_v2, %v3806_v12  ;;  %v1212_v28 = vsel %vm1211_vm4, %v966_v42, %v1210_v58  ;;  %v160_v59 = vadd.f32 %v4451_v62, %v4417_v31 }
  0xf1   :  { %v4508_v16 = vsel %vm1207_vm2, %v1554_v9, %v1490_v63  ;;  %v4515_v20 = vpop.f32.mrb[12].mxu1  ;;  %v4517_v21 = vmax.f32 %v361_v5, %v3805_v15  ;;  %v326_v23 = vrot.slane %v312_v57, %v4421_v34  ;;  %v327_v26 = vcombine.high %v319_v19, %v319_v19 }
  0xf2   :  { %v1002_v22 = vrot.slane %v835_v48, %v4432_v43  ;;  %v1311_v61 = vpack.c.bf16 %v835_v48, %v835_v48  ;;  %v4521_v24 = vpop.f32.mrb[13].mxu1  ;;  %v1010_v25 = vrot.slane %v4511_v18, %v4432_v43  ;;  %v3796_v27 = vrot.slane %v319_v19, 9 }
  0xf3   :  { %v4532_v30 = vpop.f32.mrb[14].mxu1  ;;  %v1006_v32 = vrot.slane %v4517_v21, %v4432_v43  ;;  %v4543_v42 = vcombine.high %v326_v23, %v326_v23  ;;  %v3797_v49 = vrot.slane %v327_v26, 9  ;;  %v3798_v47 = vrot.slane %v326_v23, 9 }
  0xf4   :  { %v1224_v35 = vsel %vm1213_vm5, %v1002_v22, %v1223_v7  ;;  %v4539_v41 = vunpack.c.l.b16 %v1311_v61  ;;  %v4541_v44 = vpop.f32.mrb[15].mxu1  ;;  %v827_v50 = vmax.f32 %v319_v19, %v3796_v27  ;;  %v152_v63 = vadd.f32 %v4417_v31, %v4453_v3 }
  0xf5   :  { %v1225_v51 = vsel %vm1215_vm6, %v1006_v32, %v1224_v35  ;;  %v4555_v5 = vmax.f32 %v327_v26, %v3797_v49  ;;  %v4557_v6 = vmax.f32 %v326_v23, %v3798_v47  ;;  %v204_v12 = vmax.f32 %v160_v59, 0.0 }
  0xf6   :  { %v4552_v0 = vsel %vm1217_vm7, %v1010_v25, %v1225_v51  ;;  %v970_v7 = vrot.slane %v827_v50, %v4432_v43  ;;  %v1303_v9 = vpack.c.bf16 %v827_v50, %v827_v50  ;;  %v202_v15 = vmax.f32 %v152_v63, 0.0 }
  0xf7   :  { %v974_v62 = vrot.slane %v4555_v5, %v4432_v43  ;;  %v978_v3 = vrot.slane %v4557_v6, %v4432_v43  ;;  %v163_v57 = vadd.f32 %v4455_v8, %v4417_v31  ;;  %v397_v61 = vcombine.high %v204_v12, %v204_v12 }
  0xf8   :  { %v1214_v19 = vsel %vm1213_vm5, %v970_v7, %v1212_v28  ;;  %v4569_v22 = vunpack.c.l.b16 %v1303_v9  ;;  %v404_v23 = vrot.slane %v204_v12, %v4421_v34  ;;  %v363_v26 = vcombine.high %v202_v15, %v202_v15 }
  0xf9   :  { %v1216_v25 = vsel %vm1215_vm6, %v974_v62, %v1214_v19  ;;  %v370_v27 = vrot.slane %v202_v15, %v4421_v34  ;;  %v205_v32 = vmax.f32 %v163_v57, 0.0  ;;  %v411_v8 = vrot.slane %v397_v61, %v4421_v34 }
  0xfa   :  { %v4575_v35 = vsel %vm1217_vm7, %v978_v3, %v1216_v25  ;;  %v412_v47 = vcombine.high %v404_v23, %v404_v23  ;;  %v3816_v28 = vrot.slane %v404_v23, 9  ;;  %v377_v50 = vrot.slane %v363_v26, %v4421_v34 }
  0xfb   :  { %v378_v51 = vcombine.high %v370_v27, %v370_v27  ;;  %v3808_v59 = vrot.slane %v370_v27, 9  ;;  %v413_v63 = vcombine.high %v411_v8, %v411_v8  ;;  %v3818_v9 = vrot.slane %v411_v8, 9 }
  0xfc   :  { %v3817_v7 = vrot.slane %v412_v47, 9  ;;  %v270_v12 = vsel %vm4528_vm8, %v205_v32, 0.0  ;;  %v847_v15 = vmax.f32 %v404_v23, %v3816_v28  ;;  %v379_v62 = vcombine.high %v377_v50, %v377_v50 }
  0xfd   :  { %v3809_v3 = vrot.slane %v378_v51, 9  ;;  %v3810_v57 = vrot.slane %v377_v50, 9  ;;  %v3819_v19 = vrot.slane %v413_v63, 9  ;;  %v849_v58 = vmax.f32 %v411_v8, %v3818_v9 }
  0xfe   :  { %v848_v25 = vmax.f32 %v412_v47, %v3817_v7  ;;  %v839_v61 = vmax.f32 %v370_v27, %v3808_v59  ;;  %v1050_v56 = vrot.slane %v847_v15, %v4432_v43  ;;  %v1323_v49 = vpack.c.bf16 %v847_v15, %v847_v15 }
  0xff   :  { %v3811_v26 = vrot.slane %v379_v62, 9  ;;  %v840_v14 = vmax.f32 %v378_v51, %v3809_v3  ;;  %v850_v46 = vmax.f32 %v413_v63, %v3819_v19  ;;  %v1058_v37 = vrot.slane %v849_v58, %v4432_v43 }
 0x100   :  { %v1054_v10 = vrot.slane %v848_v25, %v4432_v43  ;;  %v1324_v52 = vpack.c.bf16 %v848_v25, %v848_v25  ;;  %v1325_v32 = vpack.c.bf16 %v849_v58, %v849_v58  ;;  %v1514_v23 = vunpack.c.l.b16 %v1323_v49 }
 0x101   :  { %v841_v28 = vmax.f32 %v377_v50, %v3810_v57  ;;  %v842_v48 = vmax.f32 %v379_v62, %v3811_v26  ;;  %v1062_v17 = vrot.slane %v850_v46, %v4432_v43  ;;  %v1326_v27 = vpack.c.bf16 %v850_v46, %v850_v46 }
 0x102   :  { %v1235_v8 = vsel %vm1207_vm2, %v1054_v10, %v1050_v56  ;;  %v1515_v47 = vunpack.c.l.b16 %v1324_v52  ;;  %v4588_v7 = vunpack.c.l.b16 %v1325_v32  ;;  %v1018_v51 = vrot.slane %v839_v61, %v4432_v43 }
 0x103   :  { %v1236_v59 = vsel %vm1209_vm3, %v1058_v37, %v1235_v8  ;;  %v1022_v63 = vrot.slane %v840_v14, %v4432_v43  ;;  %v4592_v9 = vunpack.c.l.b16 %v1326_v27  ;;  %v1026_v49 = vrot.slane %v841_v28, %v4432_v43 }
 0x104   :  { %v1596_v58 = vrot.slane %v1515_v47, 7  ;;  %v1030_v50 = vrot.slane %v842_v48, %v4432_v43  ;;  %v1315_v56 = vpack.c.bf16 %v839_v61, %v839_v61  ;;  %v1316_v10 = vpack.c.bf16 %v840_v14, %v840_v14 }
 0x105   :  { %6003 = vst [vmem:[#allocation6_spill] sm:$0xff] %v4592_v9  ;;  %v1228_v46 = vsel %vm1207_vm2, %v1022_v63, %v1018_v51  ;;  %v1317_v57 = vpack.c.bf16 %v841_v28, %v841_v28  ;;  %v1318_v19 = vpack.c.bf16 %v842_v48, %v842_v48  ;;  %v414_v52 = vcombine.high %v270_v12, %v270_v12 }
 0x106   :  { %v4599_v37 = vsel %vm1207_vm2, %v1596_v58, %v1514_v23  ;;  %v1229_v3 = vsel %vm1209_vm3, %v1026_v49, %v1228_v46  ;;  %v1506_v25 = vunpack.c.l.b16 %v1315_v56  ;;  %v1507_v26 = vunpack.c.l.b16 %v1316_v10 }
 0x107   :  { %v4603_v32 = vunpack.c.l.b16 %v1317_v57  ;;  %v421_v8 = vrot.slane %v270_v12, %v4421_v34  ;;  %v1237_v27 = vsel %vm1211_vm4, %v1062_v17, %v1236_v59  ;;  %v155_v14 = vadd.f32 %v4417_v31, %v4458_v13 }
 0x108   :  { %v4609_v61 = vunpack.c.l.b16 %v1318_v19  ;;  %v1582_v23 = vrot.slane %v1507_v26, 7  ;;  %v428_v47 = vrot.slane %v414_v52, %v4421_v34  ;;  %v1230_v28 = vsel %vm1211_vm4, %v1030_v50, %v1229_v3 }
 0x109   :  { %v429_v51 = vcombine.high %v421_v8, %v421_v8  ;;  %v3820_v63 = vrot.slane %v421_v8, 9  ;;  %v203_v58 = vmax.f32 %v155_v14, 0.0  ;;  %v176_v57 = vadd.f32 %v4470_v38, %v4417_v31 }
 0x10a   :  { %v4615_v49 = vsel %vm1207_vm2, %v1582_v23, %v1506_v25  ;;  %v4618_v12 = vcombine.high %v428_v47, %v428_v47  ;;  %v3822_v13 = vrot.slane %v428_v47, 9  ;;  %v168_v19 = vadd.f32 %v4417_v31, %v4475_v45 }
 0x10b   :  { %v3821_v59 = vrot.slane %v429_v51, 9  ;;  %v851_v46 = vmax.f32 %v421_v8, %v3820_v63  ;;  %v380_v56 = vcombine.high %v203_v58, %v203_v58  ;;  %v387_v10 = vrot.slane %v203_v58, %v4421_v34 }
 0x10c   :  { %v4622_v3 = vmax.f32 %v428_v47, %v3822_v13  ;;  %v208_v17 = vmax.f32 %v176_v57, 0.0  ;;  %v206_v15 = vmax.f32 %v168_v19, 0.0 }
 0x10d   :  { %v852_v25 = vmax.f32 %v429_v51, %v3821_v59  ;;  %v1066_v26 = vrot.slane %v851_v46, %v4432_v43  ;;  %v1327_v52 = vpack.c.bf16 %v851_v46, %v851_v46  ;;  %v394_v14 = vrot.slane %v380_v56, %v4421_v34 }
 0x10e   :  { %v395_v47 = vcombine.high %v387_v10, %v387_v10  ;;  %v3812_v63 = vrot.slane %v387_v10, 9  ;;  %v472_v2 = vrot.slane %v208_v17, %v4421_v34  ;;  %v438_v53 = vrot.slane %v206_v15, %v4421_v34 }
 0x10f   :  { %v1070_v58 = vrot.slane %v852_v25, %v4432_v43  ;;  %v1238_v38 = vsel %vm1213_vm5, %v1066_v26, %v1237_v27  ;;  %v1328_v13 = vpack.c.bf16 %v852_v25, %v852_v25  ;;  %v4636_v45 = vunpack.c.l.b16 %v1327_v52 }
 0x110   :  { %v396_v51 = vcombine.high %v394_v14, %v394_v14  ;;  %v3813_v59 = vrot.slane %v395_v47, 9  ;;  %v3814_v46 = vrot.slane %v394_v14, 9  ;;  %v843_v62 = vmax.f32 %v387_v10, %v3812_v63 }
 0x111   :  { %6004 = vst [vmem:[#allocation7_spill] sm:$0xff] %v4636_v45  ;;  %v4639_v56 = vsel %vm1215_vm6, %v1070_v58, %v1238_v38  ;;  %v4641_v8 = vunpack.c.l.b16 %v1328_v13  ;;  %v465_v52 = vcombine.high %v208_v17, %v208_v17  ;;  %v480_v17 = vcombine.high %v472_v2, %v472_v2 }
 0x112   :  { %6005 = vst [vmem:[#allocation8_spill] sm:$0xff] %v4639_v56  ;;  %v3815_v48 = vrot.slane %v396_v51, 9  ;;  %v844_v23 = vmax.f32 %v395_v47, %v3813_v59  ;;  %v845_v50 = vmax.f32 %v394_v14, %v3814_v46  ;;  %v1034_v27 = vrot.slane %v843_v62, %v4432_v43 }
 0x113   :  { %6006 = vst [vmem:[#allocation9_spill] sm:$0xff] %v4641_v8  ;;  %v1319_v26 = vpack.c.bf16 %v843_v62, %v843_v62  ;;  %v479_v14 = vrot.slane %v465_v52, %v4421_v34  ;;  %v431_v62 = vcombine.high %v206_v15, %v206_v15  ;;  %v446_v56 = vcombine.high %v438_v53, %v438_v53 }
 0x114   :  { %v4647_v10 = vmax.f32 %v396_v51, %v3815_v48  ;;  %v1038_v63 = vrot.slane %v844_v23, %v4432_v43  ;;  %v1042_v58 = vrot.slane %v845_v50, %v4432_v43  ;;  %v1231_v38 = vsel %vm1213_vm5, %v1034_v27, %v1230_v28 }
 0x115   :  { %v1320_v57 = vpack.c.bf16 %v844_v23, %v844_v23  ;;  %v1321_v13 = vpack.c.bf16 %v845_v50, %v845_v50  ;;  %v4652_v47 = vunpack.c.l.b16 %v1319_v26  ;;  %v3832_v48 = vrot.slane %v472_v2, 9 }
 0x116   :  { %v1232_v59 = vsel %vm1215_vm6, %v1038_v63, %v1231_v38  ;;  %v481_v50 = vcombine.high %v479_v14, %v479_v14  ;;  %v3833_v23 = vrot.slane %v480_v17, 9  ;;  %v3834_v27 = vrot.slane %v479_v14, 9 }
 0x117   :  { %v4659_v51 = vsel %vm1217_vm7, %v1042_v58, %v1232_v59  ;;  %v4661_v46 = vunpack.c.l.b16 %v1320_v57  ;;  %v4663_v25 = vunpack.c.l.b16 %v1321_v13  ;;  %v863_v26 = vmax.f32 %v472_v2, %v3832_v48 }
 0x118   :  { %v179_v63 = vadd.f32 %v4479_v54, %v4417_v31  ;;  %v4671_v58 = vadd.f32 %v4417_v31, %v4486_v60  ;;  %v3835_v38 = vrot.slane %v481_v50, 9  ;;  %v864_v57 = vmax.f32 %v480_v17, %v3833_v23 }
 0x119   :  { %6007 = vst [vmem:[#allocation10_spill] sm:$0xff] %v4661_v46  ;;  %v865_v13 = vmax.f32 %v479_v14, %v3834_v27  ;;  %v1114_v59 = vrot.slane %v863_v26, %v4432_v43  ;;  %v1339_v28 = vpack.c.bf16 %v863_v26, %v863_v26  ;;  %v445_v60 = vrot.slane %v431_v62, %v4421_v34 }
 0x11a   :  { %v209_v2 = vmax.f32 %v179_v63, 0.0  ;;  %v866_v48 = vmax.f32 %v481_v50, %v3835_v38  ;;  %v1118_v19 = vrot.slane %v864_v57, %v4432_v43  ;;  %v1340_v54 = vpack.c.bf16 %v864_v57, %v864_v57 }
 0x11b   :  { %v1122_v52 = vrot.slane %v865_v13, %v4432_v43  ;;  %v1341_v36 = vpack.c.bf16 %v865_v13, %v865_v13  ;;  %v1530_v8 = vunpack.c.l.b16 %v1339_v28  ;;  %v447_v50 = vcombine.high %v445_v60, %v445_v60 }
 0x11c   :  { %v1126_v14 = vrot.slane %v866_v48, %v4432_v43  ;;  %v1249_v17 = vsel %vm1207_vm2, %v1118_v19, %v1114_v59  ;;  %v1342_v23 = vpack.c.bf16 %v866_v48, %v866_v48  ;;  %v1531_v27 = vunpack.c.l.b16 %v1340_v54 }
 0x11d   :  { %v1250_v15 = vsel %vm1209_vm3, %v1122_v52, %v1249_v17  ;;  %v4681_v26 = vunpack.c.l.b16 %v1341_v36  ;;  %v3824_v63 = vrot.slane %v438_v53, 9  ;;  %v3825_v13 = vrot.slane %v446_v56, 9 }
 0x11e   :  { %v4683_v38 = vunpack.c.l.b16 %v1342_v23  ;;  %v1624_v57 = vrot.slane %v1531_v27, 7  ;;  %v3826_v28 = vrot.slane %v445_v60, 9  ;;  %v3827_v45 = vrot.slane %v447_v50, 9 }
 0x11f   :  { %6008 = vst [vmem:[#allocation11_spill] sm:$0xff] %v4681_v26  ;;  %v855_v46 = vmax.f32 %v438_v53, %v3824_v63  ;;  %v482_v9 = vcombine.high %v209_v2, %v209_v2  ;;  %v856_v52 = vmax.f32 %v446_v56, %v3825_v13  ;;  %v489_v23 = vrot.slane %v209_v2, %v4421_v34 }
 0x120   :  { %6009 = vst [vmem:[#allocation12_spill] sm:$0xff] %v4683_v38  ;;  %v4687_v59 = vsel %vm1207_vm2, %v1624_v57, %v1530_v8  ;;  %v857_v36 = vmax.f32 %v445_v60, %v3826_v28  ;;  %v858_v19 = vmax.f32 %v447_v50, %v3827_v45 }
 0x121   :  { %6010 = vst [vmem:[#allocation13_spill] sm:$0xff] %v4687_v59  ;;  %v1082_v54 = vrot.slane %v855_v46, %v4432_v43  ;;  %v1331_v17 = vpack.c.bf16 %v855_v46, %v855_v46  ;;  %v1086_v27 = vrot.slane %v856_v52, %v4432_v43  ;;  %v1332_v26 = vpack.c.bf16 %v856_v52, %v856_v52 }
 0x122   :  { %v1090_v62 = vrot.slane %v857_v36, %v4432_v43  ;;  %v1333_v53 = vpack.c.bf16 %v857_v36, %v857_v36  ;;  %v1094_v63 = vrot.slane %v858_v19, %v4432_v43  ;;  %v1334_v8 = vpack.c.bf16 %v858_v19, %v858_v19 }
 0x123   :  { %v1522_v57 = vunpack.c.l.b16 %v1331_v17  ;;  %v496_v48 = vrot.slane %v482_v9, %v4421_v34  ;;  %v1242_v56 = vsel %vm1207_vm2, %v1086_v27, %v1082_v54  ;;  %v1523_v45 = vunpack.c.l.b16 %v1332_v26 }
 0x124   :  { %v4697_v60 = vunpack.c.l.b16 %v1333_v53  ;;  %v497_v46 = vcombine.high %v489_v23, %v489_v23  ;;  %v1243_v2 = vsel %vm1209_vm3, %v1090_v62, %v1242_v56  ;;  %v4700_v50 = vunpack.c.l.b16 %v1334_v8 }
 0x125   :  { %v498_v13 = vcombine.high %v496_v48, %v496_v48  ;;  %v3836_v28 = vrot.slane %v489_v23, 9  ;;  %v1610_v52 = vrot.slane %v1523_v45, 7  ;;  %v3838_v19 = vrot.slane %v496_v48, 9 }
 0x126   :  { %6011 = vst [vmem:[#allocation14_spill] sm:$0xff] %v4697_v60  ;;  %6012 = vst [vmem:[#allocation15_spill] sm:$0xff] %v4700_v50  ;;  %v3837_v38 = vrot.slane %v497_v46, 9  ;;  %v1251_v26 = vsel %vm1211_vm4, %v1126_v14, %v1250_v15  ;;  %v207_v53 = vmax.f32 %v4671_v58, 0.0  ;;  %v1244_v36 = vsel %vm1211_vm4, %v1094_v63, %v1243_v2 }
 0x127   :  { %v3839_v9 = vrot.slane %v498_v13, 9  ;;  %v867_v59 = vmax.f32 %v489_v23, %v3836_v28  ;;  %v4706_v54 = vsel %vm1207_vm2, %v1610_v52, %v1522_v57  ;;  %v4708_v62 = vmax.f32 %v496_v48, %v3838_v19 }
 0x128   :  { %6013 = vst [vmem:[#allocation16_spill] sm:$0xff] %v4706_v54  ;;  %v868_v27 = vmax.f32 %v497_v46, %v3837_v38  ;;  %v448_v57 = vcombine.high %v207_v53, %v207_v53  ;;  %v455_v2 = vrot.slane %v207_v53, %v4421_v34  ;;  %v192_v52 = vadd.f32 %v4515_v20, %v4417_v31 }
 0x129   :  { %6014 = vst [vmem:[#allocation17_spill] sm:$0xff] %v4708_v62  ;;  %v4711_v8 = vmax.f32 %v498_v13, %v3839_v9  ;;  %v1130_v56 = vrot.slane %v867_v59, %v4432_v43  ;;  %v1343_v45 = vpack.c.bf16 %v867_v59, %v867_v59  ;;  %v1345_v38 = vpack.c.bf16 %v4708_v62, %v4708_v62 }
 0x12a   :  { %v1134_v17 = vrot.slane %v868_v27, %v4432_v43  ;;  %v1344_v15 = vpack.c.bf16 %v868_v27, %v868_v27  ;;  %v462_v28 = vrot.slane %v448_v57, %v4421_v34  ;;  %v184_v19 = vadd.f32 %v4417_v31, %v4521_v24 }
 0x12b   :  { %6015 = vst [vmem:[#allocation18_spill] sm:$0xff] %v4711_v8  ;;  %v1252_v58 = vsel %vm1213_vm5, %v1130_v56, %v1251_v26  ;;  %v4723_v23 = vunpack.c.l.b16 %v1343_v45  ;;  %v4730_v46 = vunpack.c.l.b16 %v1345_v38  ;;  %v6020_v9 = vand.u32 63, %v4428_v39 }
 0x12c   :  { %v4726_v59 = vsel %vm1215_vm6, %v1134_v17, %v1252_v58  ;;  %v4728_v63 = vunpack.c.l.b16 %v1344_v15  ;;  %v463_v27 = vcombine.high %v455_v2, %v455_v2  ;;  %v3828_v53 = vrot.slane %v455_v2, 9 }
 0x12d   :  { %6016 = vst [vmem:[#allocation19_spill] sm:$0xff] %v4723_v23  ;;  %6017 = vst [vmem:[#allocation20_spill] sm:$0xff] %v4726_v59  ;;  %vm4741_vm9 = vcmp.lt.s32.totalorder %v6020_v9, 62  ;;  %v195_v56 = vadd.f32 %v4532_v30, %v4417_v31  ;;  %v464_v45 = vcombine.high %v462_v28, %v462_v28  ;;  %v3830_v15 = vrot.slane %v462_v28, 9 }
 0x12e   :  { %6018 = vst [vmem:[#allocation21_spill] sm:$0xff] %v4728_v63  ;;  %6019 = vst [vmem:[#allocation22_spill] sm:$0xff] %v4730_v46  ;;  %v212_v38 = vmax.f32 %v192_v52, 0.0  ;;  %v210_v20 = vmax.f32 %v184_v19, 0.0  ;;  %v3829_v58 = vrot.slane %v463_v27, 9  ;;  %v859_v57 = vmax.f32 %v455_v2, %v3828_v53 }
 0x12f   :  { %v213_v24 = vmax.f32 %v195_v56, 0.0  ;;  %v4750_v39 = vadd.f32 %v4417_v31, %v4541_v44  ;;  %v3831_v9 = vrot.slane %v464_v45, 9  ;;  %v4752_v48 = vmax.f32 %v462_v28, %v3830_v15 }
 0x130   :  { %v533_v26 = vcombine.high %v212_v38, %v212_v38  ;;  %v540_v14 = vrot.slane %v212_v38, %v4421_v34  ;;  %v860_v13 = vmax.f32 %v463_v27, %v3829_v58  ;;  %v1098_v30 = vrot.slane %v859_v57, %v4432_v43 }
 0x131   :  { %v1335_v63 = vpack.c.bf16 %v859_v57, %v859_v57  ;;  %v499_v62 = vcombine.high %v210_v20, %v210_v20  ;;  %v4756_v52 = vmax.f32 %v464_v45, %v3831_v9  ;;  %v1337_v31 = vpack.c.bf16 %v4752_v48, %v4752_v48 }
 0x132   :  { %v547_v44 = vrot.slane %v533_v26, %v4421_v34  ;;  %v1102_v28 = vrot.slane %v860_v13, %v4432_v43  ;;  %v1245_v19 = vsel %vm1213_vm5, %v1098_v30, %v1244_v36  ;;  %v1336_v53 = vpack.c.bf16 %v860_v13, %v860_v13 }
 0x133   :  { %v4765_v27 = vunpack.c.l.b16 %v1335_v63  ;;  %v4769_v45 = vunpack.c.l.b16 %v1337_v31  ;;  %v548_v15 = vcombine.high %v540_v14, %v540_v14  ;;  %v3848_v9 = vrot.slane %v540_v14, 9 }
 0x134   :  { %v549_v38 = vcombine.high %v547_v44, %v547_v44  ;;  %v4772_v58 = vsel %vm1215_vm6, %v1102_v28, %v1245_v19  ;;  %v4774_v57 = vunpack.c.l.b16 %v1336_v53  ;;  %v3850_v36 = vrot.slane %v547_v44, 9 }
 0x135   :  { %6023 = vst [vmem:[#allocation23_spill] sm:$0xff] %v4765_v27  ;;  %6024 = vst [vmem:[#allocation24_spill] sm:$0xff] %v4769_v45  ;;  %v3849_v2 = vrot.slane %v548_v15, 9  ;;  %v506_v63 = vrot.slane %v210_v20, %v4421_v34  ;;  %v879_v56 = vmax.f32 %v540_v14, %v3848_v9  ;;  %v513_v31 = vrot.slane %v499_v62, %v4421_v34 }
 0x136   :  { %6025 = vst [vmem:[#allocation25_spill] sm:$0xff] %v4774_v57  ;;  %v3851_v13 = vrot.slane %v549_v38, 9  ;;  %v278_v59 = vsel %vm4741_vm9, %v213_v24, 0.0  ;;  %v881_v19 = vmax.f32 %v547_v44, %v3850_v36 }
 0x137   :  { %v880_v28 = vmax.f32 %v548_v15, %v3849_v2  ;;  %v514_v23 = vcombine.high %v506_v63, %v506_v63  ;;  %v1178_v26 = vrot.slane %v879_v56, %v4432_v43  ;;  %v1355_v27 = vpack.c.bf16 %v879_v56, %v879_v56 }
 0x138   :  { %v882_v53 = vmax.f32 %v549_v38, %v3851_v13  ;;  %v515_v46 = vcombine.high %v513_v31, %v513_v31  ;;  %v3840_v45 = vrot.slane %v506_v63, 9  ;;  %v1186_v20 = vrot.slane %v881_v19, %v4432_v43 }
 0x139   :  { %v1182_v50 = vrot.slane %v880_v28, %v4432_v43  ;;  %v1356_v9 = vpack.c.bf16 %v880_v28, %v880_v28  ;;  %v1357_v62 = vpack.c.bf16 %v881_v19, %v881_v19  ;;  %v1546_v17 = vunpack.c.l.b16 %v1355_v27 }
 0x13a   :  { %v1190_v14 = vrot.slane %v882_v53, %v4432_v43  ;;  %v1358_v30 = vpack.c.bf16 %v882_v53, %v882_v53  ;;  %v3841_v24 = vrot.slane %v514_v23, 9  ;;  %v3842_v15 = vrot.slane %v513_v31, 9 }
 0x13b   :  { %v1263_v2 = vsel %vm1207_vm2, %v1182_v50, %v1178_v26  ;;  %v1547_v44 = vunpack.c.l.b16 %v1356_v9  ;;  %v3843_v38 = vrot.slane %v515_v46, 9  ;;  %v4788_v36 = vunpack.c.l.b16 %v1357_v62 }
 0x13c   :  { %v1264_v56 = vsel %vm1209_vm3, %v1186_v20, %v1263_v2  ;;  %v4790_v13 = vunpack.c.l.b16 %v1358_v30  ;;  %v871_v57 = vmax.f32 %v506_v63, %v3840_v45  ;;  %v872_v54 = vmax.f32 %v514_v23, %v3841_v24 }
 0x13d   :  { %v1652_v60 = vrot.slane %v1547_v44, 7  ;;  %v873_v8 = vmax.f32 %v513_v31, %v3842_v15  ;;  %v874_v28 = vmax.f32 %v515_v46, %v3843_v38  ;;  %v550_v62 = vcombine.high %v278_v59, %v278_v59 }
 0x13e   :  { %v1146_v50 = vrot.slane %v871_v57, %v4432_v43  ;;  %v1347_v26 = vpack.c.bf16 %v871_v57, %v871_v57  ;;  %v1150_v20 = vrot.slane %v872_v54, %v4432_v43  ;;  %v1348_v63 = vpack.c.bf16 %v872_v54, %v872_v54 }
 0x13f   :  { %v4796_v53 = vsel %vm1207_vm2, %v1652_v60, %v1546_v17  ;;  %v1154_v30 = vrot.slane %v873_v8, %v4432_v43  ;;  %v1158_v45 = vrot.slane %v874_v28, %v4432_v43  ;;  %v1349_v23 = vpack.c.bf16 %v873_v8, %v873_v8 }
 0x140   :  { %v1350_v31 = vpack.c.bf16 %v874_v28, %v874_v28  ;;  %v1538_v46 = vunpack.c.l.b16 %v1347_v26  ;;  %v1256_v9 = vsel %vm1207_vm2, %v1150_v20, %v1146_v50  ;;  %v557_v24 = vrot.slane %v278_v59, %v4421_v34 }
 0x141   :  { %v1265_v57 = vsel %vm1211_vm4, %v1190_v14, %v1264_v56  ;;  %v1257_v60 = vsel %vm1209_vm3, %v1154_v30, %v1256_v9  ;;  %v1539_v17 = vunpack.c.l.b16 %v1348_v63  ;;  %v4805_v2 = vunpack.c.l.b16 %v1349_v23 }
 0x142   :  { %v4807_v44 = vunpack.c.l.b16 %v1350_v31  ;;  %v564_v15 = vrot.slane %v550_v62, %v4421_v34  ;;  %v565_v54 = vcombine.high %v557_v24, %v557_v24  ;;  %v3852_v8 = vrot.slane %v557_v24, 9 }
 0x143   :  { %v211_v38 = vmax.f32 %v4750_v39, 0.0  ;;  %v1638_v28 = vrot.slane %v1539_v17, 7  ;;  %v1258_v14 = vsel %vm1211_vm4, %v1158_v45, %v1257_v60  ;;  %v6026_v39 = vrot.slane %v4543_v42, 9 }
 0x144   :  { %v4814_v56 = vcombine.high %v564_v15, %v564_v15  ;;  %v3853_v26 = vrot.slane %v565_v54, 9  ;;  %v3854_v20 = vrot.slane %v564_v15, 9  ;;  %v883_v30 = vmax.f32 %v557_v24, %v3852_v8 }
 0x145   :  { %v4817_v63 = vsel %vm1207_vm2, %v1638_v28, %v1538_v46  ;;  %v516_v23 = vcombine.high %v211_v38, %v211_v38  ;;  %v523_v31 = vrot.slane %v211_v38, %v4421_v34  ;;  %v4823_v9 = vmax.f32 %v4543_v42, %v6026_v39 }
 0x146   :  { %v884_v17 = vmax.f32 %v565_v54, %v3853_v26  ;;  %v4826_v45 = vmax.f32 %v564_v15, %v3854_v20  ;;  %v1194_v60 = vrot.slane %v883_v30, %v4432_v43  ;;  %v1359_v24 = vpack.c.bf16 %v883_v30, %v883_v30 }
 0x147   :  { %v530_v46 = vrot.slane %v516_v23, %v4421_v34  ;;  %v531_v8 = vcombine.high %v523_v31, %v523_v31  ;;  %v3844_v28 = vrot.slane %v523_v31, 9 }
 0x148   :  { %v1198_v38 = vrot.slane %v884_v17, %v4432_v43  ;;  %v1266_v42 = vsel %vm1213_vm5, %v1194_v60, %v1265_v57  ;;  %v1360_v39 = vpack.c.bf16 %v884_v17, %v884_v17  ;;  %v4836_v54 = vunpack.c.l.b16 %v1359_v24 }
 0x149   :  { %v532_v26 = vcombine.high %v530_v46, %v530_v46  ;;  %v3845_v20 = vrot.slane %v531_v8, 9  ;;  %v3846_v59 = vrot.slane %v530_v46, 9  ;;  %v875_v19 = vmax.f32 %v523_v31, %v3844_v28 }
 0x14a   :  { %v4839_v30 = vsel %vm1215_vm6, %v1198_v38, %v1266_v42  ;;  %v4841_v23 = vunpack.c.l.b16 %v1360_v39  ;;  %v6027_v57 = vrot.slane %v4501_v11, 9  ;;  %v982_v28 = vrot.slane %v4823_v9, %v4432_v43 }
 0x14b   :  { %v3847_v27 = vrot.slane %v532_v26, 9  ;;  %v876_v62 = vmax.f32 %v531_v8, %v3845_v20  ;;  %v4848_v24 = vmax.f32 %v530_v46, %v3846_v59  ;;  %v1162_v15 = vrot.slane %v875_v19, %v4432_v43 }
 0x14c   :  { %v838_v17 = vmax.f32 %v4501_v11, %v6027_v57  ;;  %v1351_v38 = vpack.c.bf16 %v875_v19, %v875_v19 }
 0x14d   :  { %v4851_v42 = vmax.f32 %v532_v26, %v3847_v27  ;;  %v1166_v39 = vrot.slane %v876_v62, %v4432_v43  ;;  %v1352_v31 = vpack.c.bf16 %v876_v62, %v876_v62  ;;  %v1170_v8 = vrot.slane %v4848_v24, %v4432_v43 }
 0x14e   :  { %v1259_v11 = vsel %vm1213_vm5, %v1162_v15, %v1258_v14  ;;  %v1353_v59 = vpack.c.bf16 %v4848_v24, %v4848_v24  ;;  %v4861_v46 = vunpack.c.l.b16 %v1351_v38  ;;  %v1014_v26 = vrot.slane %v838_v17, %v4432_v43 }
 0x14f   :  { %v4866_v27 = vsel %vm1215_vm6, %v1166_v39, %v1259_v11  ;;  %v4868_v62 = vunpack.c.l.b16 %v1352_v31  ;;  %v1305_v14 = vpack.c.bf16 %v4557_v6, %v4557_v6  ;;  %v1306_v15 = vpack.c.bf16 %v4823_v9, %v4823_v9 }
 0x150   :  { %v4871_v20 = vunpack.c.l.b16 %v1353_v59  ;;  %v4881_v39 = vsel %vm1219_vm10, %v1014_v26, %v4552_v0  ;;  %v1313_v31 = vpack.c.bf16 %v4511_v18, %v4511_v18  ;;  %v1314_v11 = vpack.c.bf16 %v838_v17, %v838_v17 }
 0x151   :  { %v6028_v59 = vpack.c.bf16 %v4555_v5, %v4555_v5  ;;  %v1496_v50 = vunpack.c.l.b16 %v1305_v14  ;;  %v1497_v57 = vunpack.c.l.b16 %v1306_v15  ;;  %v6029_v6 = vpack.c.bf16 %v4517_v21, %v4517_v21 }
 0x152   :  { %v1504_v19 = vunpack.c.l.b16 %v1313_v31  ;;  %v1505_v38 = vunpack.c.l.b16 %v1314_v11  ;;  %v6030_v0 = vrot.slane %v4488_v1, 6  ;;  %v6031_v18 = vrot.slane %v4466_v33, 6 }
 0x153   :  { %v1495_v60 = vunpack.c.l.b16 %v6028_v59  ;;  %v1503_v9 = vunpack.c.l.b16 %v6029_v6  ;;  %v6032_v5 = vrot.slane %v4494_v4, 5  ;;  %v1564_v59 = vrot.slane %v1496_v50, 2 }
 0x154   :  { %v1557_v26 = vsel %vm1209_vm3, %v6030_v0, %v4508_v16  ;;  %v1571_v17 = vsel %vm1209_vm3, %v6031_v18, %v4482_v55  ;;  %v1566_v21 = vrot.slane %v1497_v57, 1  ;;  %v6033_v31 = vrot.slane %v4569_v22, 4 }
 0x155   :  { %v1559_v14 = vsel %vm1211_vm4, %v6032_v5, %v1557_v26  ;;  %v1562_v15 = vrot.slane %v1495_v60, 3  ;;  %v6034_v1 = vrot.slane %v4472_v40, 5  ;;  %v1576_v6 = vrot.slane %v1503_v9, 3 }
 0x156   :  { %v1561_v11 = vsel %vm1213_vm5, %v6033_v31, %v1559_v14  ;;  %v1578_v0 = vrot.slane %v1504_v19, 2  ;;  %v6035_v55 = vrot.slane %v4539_v41, 4  ;;  %v1580_v26 = vrot.slane %v1505_v38, 1 }
 0x157   :  { %v1573_v16 = vsel %vm1211_vm4, %v6034_v1, %v1571_v17  ;;  %v1563_v33 = vsel %vm1215_vm6, %v1562_v15, %v1561_v11  ;;  %v4914_v50 = vsel %vm1219_vm10, %v982_v28, %v4575_v35  ;;  %v6036_v40 = vrot.slane %v4647_v10, %v4432_v43 }
 0x158   :  { %v1575_v4 = vsel %vm1213_vm5, %v6035_v55, %v1573_v16  ;;  %v1565_v22 = vsel %vm1217_vm7, %v1564_v59, %v1563_v33  ;;  %v1405_v41 = vrot.slane %v4914_v50, 3  ;;  %v1406_v35 = vrot.slane %v4881_v39, 3 }
 0x159   :  { %v1577_v60 = vsel %vm1215_vm6, %v1576_v6, %v1575_v4  ;;  %v4923_v19 = vsel %vm1219_vm10, %v6036_v40, %v4659_v51  ;;  %v1567_v57 = vsel %vm1219_vm10, %v1566_v21, %v1565_v22  ;;  %v1384_v18 = vrot.slane %v4914_v50, 2 }
 0x15a   :  { %v1579_v38 = vsel %vm1217_vm7, %v1578_v0, %v1577_v60  ;;  %v1407_v28 = vrot.slane %v4923_v19, 3  ;;  %v1420_v5 = vsel %vm1413_vm11, %v1405_v41, %v1406_v35  ;;  %v1385_v14 = vrot.slane %v4881_v39, 2 }
 0x15b   :  { %v1581_v9 = vsel %vm1219_vm10, %v1580_v26, %v1579_v38  ;;  %v1386_v59 = vrot.slane %v4923_v19, 2  ;;  %v1363_v21 = vrot.slane %v4914_v50, 1  ;;  %v1364_v11 = vrot.slane %v4881_v39, 1 }
 0x15c   :  { %v1666_v17 = vpack.c.b16 %v1581_v9, %v1567_v57  ;;  %v1419_v51 = vsel %vm1413_vm11, %v1406_v35, %v1407_v28  ;;  %v1399_v31 = vsel %vm1392_vm13, %v1384_v18, %v1385_v14  ;;  %v1365_v1 = vrot.slane %v4923_v19, 1 }
 0x15d   :  { %v1422_v15 = vpack.c.bf16 %v1419_v51, %v1420_v5  ;;  %v1398_v16 = vsel %vm1392_vm13, %v1385_v14, %v1386_v59  ;;  %v6037_v6 = vrot.slane %v4618_v12, 9  ;;  %v1322_v33 = vpack.c.bf16 %v4647_v10, %v4647_v10 }
 0x15e   :  { %1670 = vrot.lane.b32.xlu0 %v1666_v17, %s4285_s0  ;;  %v6038_v55 = vpack.c.bf16 %v4622_v3, %v4622_v3  ;;  %v1401_v26 = vpack.c.bf16 %v1398_v16, %v1399_v31  ;;  %v1377_v22 = vsel %vm1371_vm14, %v1364_v11, %v1365_v1  ;;  %v1378_v60 = vsel %vm1371_vm14, %v1363_v21, %v1364_v11 }
 0x15f   :  { %3867 = vmatprep.mubr.msk.bf16.mxu1 %vm1702_vm12, %v1422_v15  ;;  %v854_v0 = vmax.f32 %v4618_v12, %v6037_v6  ;;  %v6039_v40 = vrot.slane %v4603_v32, 6  ;;  %v1380_v57 = vpack.c.bf16 %v1377_v22, %v1378_v60  ;;  %v1513_v35 = vunpack.c.l.b16 %v1322_v33  ;;  %v6047_v33 = vld [vmem:[#allocation7_spill] sm:$0xff] }
 0x160   :  { %v1520_v4 = vunpack.c.l.b16 %v6038_v55  ;;  %1694 = vrot.lane.b32.xlu1 %v1401_v26, %s4286_s2  ;;  %v6040_v9 = vrot.slane %v4609_v61, 5  ;;  %v1592_v51 = vrot.slane %v4663_v25, 2  ;;  %v6041_v5 = vrot.slane %v4588_v7, 6  ;;  %v6043_v61 = vld [vmem:[#allocation6_spill] sm:$0xff] }
 0x161   :  { %v1585_v12 = vsel %vm1209_vm3, %v6039_v40, %v4615_v49  ;;  %v1078_v10 = vrot.slane %v854_v0, %v4432_v43  ;;  %v1330_v38 = vpack.c.bf16 %v854_v0, %v854_v0  ;;  %v6042_v15 = vrot.slane %v4652_v47, 4  ;;  %v6045_v25 = vld [vmem:[#allocation10_spill] sm:$0xff] }
 0x162   :  { %v1587_v17 = vsel %vm1211_vm4, %v6040_v9, %v1585_v12  ;;  %v1599_v32 = vsel %vm1209_vm3, %v6041_v5, %v4599_v37  ;;  %v1606_v49 = vrot.slane %v1520_v4, 2  ;;  %1682 = vrot.lane.b32.xlu0 %v1380_v57, %s4287_s13  ;;  %v1594_v11 = vrot.slane %v1513_v35, 1  ;;  %v6049_v4 = vld [vmem:[#allocation8_spill] sm:$0xff]  ;;  %v6052_v12 = vld [vmem:[#allocation9_spill] sm:$0xff] }
 0x163   :  { %v1521_v14 = vunpack.c.l.b16 %v1330_v38  ;;  %v1589_v31 = vsel %vm1213_vm5, %v6042_v15, %v1587_v17  ;;  %v6044_v16 = vrot.slane %v6043_v61, 5  ;;  %v6046_v0 = vrot.slane %v6045_v25, 3 }
 0x164   :  { %v6048_v37 = vrot.slane %v6047_v33, 4  ;;  %v6050_v26 = vrot.slane %v4622_v3, %v4432_v43  ;;  %v6051_v22 = vrot.slane %v4752_v48, %v4432_v43  ;;  %v6053_v57 = vrot.slane %v6052_v12, 3  ;;  %v6062_v12 = vld [vmem:[#allocation13_spill] sm:$0xff] }
 0x165   :  { %v1601_v6 = vsel %vm1211_vm4, %v6044_v16, %v1599_v32  ;;  %v1591_v7 = vsel %vm1215_vm6, %v6046_v0, %v1589_v31  ;;  %v1608_v35 = vrot.slane %v1521_v14, 1  ;;  %v6054_v5 = vrot.slane %v4756_v52, %v4432_v43  ;;  %v6056_v0 = vld [vmem:[#allocation16_spill] sm:$0xff] }
 0x166   :  { %v1603_v55 = vsel %vm1213_vm5, %v6048_v37, %v1601_v6  ;;  %v1240_v47 = vsel %vm1217_vm7, %v6050_v26, %v6049_v4  ;;  %v1247_v60 = vsel %vm1217_vm7, %v6051_v22, %v4772_v58  ;;  %v1593_v40 = vsel %vm1217_vm7, %v1592_v51, %v1591_v7  ;;  %v6057_v7 = vld [vmem:[#allocation14_spill] sm:$0xff]  ;;  %v6059_v26 = vld [vmem:[#allocation15_spill] sm:$0xff] }
 0x167   :  { %v1605_v38 = vsel %vm1215_vm6, %v6053_v57, %v1603_v55  ;;  %v5012_v9 = vsel %vm1219_vm10, %v1078_v10, %v1240_v47  ;;  %v1595_v3 = vsel %vm1219_vm10, %v1594_v11, %v1593_v40  ;;  %v5020_v48 = vsel %vm1219_vm10, %v6054_v5, %v1247_v60  ;;  %v6055_v11 = vld [vmem:[#allocation18_spill] sm:$0xff]  ;;  %v6061_v60 = vld [vmem:[#allocation24_spill] sm:$0xff]  ;;  %v6063_v57 = vld [vmem:[#allocation11_spill] sm:$0xff] }
 0x168   :  { %v1607_v17 = vsel %vm1217_vm7, %v1606_v49, %v1605_v38  ;;  %v1387_v58 = vrot.slane %v5012_v9, 2  ;;  %v1388_v32 = vrot.slane %v5020_v48, 2  ;;  %v1366_v14 = vrot.slane %v5012_v9, 1 }
 0x169   :  { %v1609_v51 = vsel %vm1219_vm10, %v1608_v35, %v1607_v17  ;;  %v1367_v10 = vrot.slane %v5020_v48, 1  ;;  %v1338_v31 = vpack.c.bf16 %v4756_v52, %v4756_v52  ;;  %v1346_v61 = vpack.c.bf16 %v6055_v11, %v6055_v11  ;;  %v6065_v35 = vld [vmem:[#allocation22_spill] sm:$0xff]  ;;  %v6066_v17 = vld [vmem:[#allocation23_spill] sm:$0xff] }
 0x16a   :  { %v1667_v15 = vpack.c.b16 %v1609_v51, %v1595_v3  ;;  %v1397_v49 = vsel %vm1392_vm13, %v1386_v59, %v1387_v58  ;;  %v1396_v16 = vsel %vm1392_vm13, %v1387_v58, %v1388_v32  ;;  %v1376_v25 = vsel %vm1371_vm14, %v1365_v1, %v1366_v14 }
 0x16b   :  { %v1375_v6 = vsel %vm1371_vm14, %v1366_v14, %v1367_v10  ;;  %v6058_v33 = vrot.slane %v6057_v7, 6  ;;  %v1402_v52 = vpack.c.bf16 %v1396_v16, %v1397_v49  ;;  %v1529_v55 = vunpack.c.l.b16 %v1338_v31  ;;  %v6068_v14 = vld [vmem:[#allocation12_spill] sm:$0xff] }
 0x16c   :  { %1672 = vrot.lane.b32.xlu1 %v1667_v15, %s4285_s0  ;;  %v1381_v37 = vpack.c.bf16 %v1375_v6, %v1376_v25  ;;  %v1537_v4 = vunpack.c.l.b16 %v1346_v61  ;;  %v6060_v47 = vrot.slane %v6059_v26, 5  ;;  %v1620_v40 = vrot.slane %v6061_v60, 2  ;;  %v6070_v61 = vld [vmem:[#allocation25_spill] sm:$0xff]  ;;  %v6072_v25 = vld [vmem:[#allocation19_spill] sm:$0xff] }
 0x16d   :  { %v1613_v59 = vsel %vm1209_vm3, %v6058_v33, %v6056_v0  ;;  %v6064_v1 = vrot.slane %v6063_v57, 6  ;;  %v1634_v3 = vrot.slane %v6065_v35, 2  ;;  %v6067_v5 = vrot.slane %v6066_v17, 4  ;;  %v6074_v33 = vld [vmem:[#allocation20_spill] sm:$0xff] }
 0x16e   :  { %v1615_v22 = vsel %vm1211_vm4, %v6060_v47, %v1613_v59  ;;  %1684 = vrot.lane.b32.xlu0 %v1381_v37, %s4287_s13  ;;  %v1622_v51 = vrot.slane %v1529_v55, 1  ;;  %v6069_v15 = vrot.slane %v6068_v14, 5  ;;  %v1636_v31 = vrot.slane %v1537_v4, 1  ;;  %v6075_v59 = vld [vmem:[#allocation17_spill] sm:$0xff] }
 0x16f   :  { %v1627_v38 = vsel %vm1209_vm3, %v6064_v1, %v6062_v12  ;;  %v1617_v58 = vsel %vm1213_vm5, %v6067_v5, %v1615_v22  ;;  %v6071_v16 = vrot.slane %v6070_v61, 3  ;;  %v6073_v0 = vrot.slane %v6072_v25, 4  ;;  %v6077_v47 = vld [vmem:[#allocation21_spill] sm:$0xff] }
 0x170   :  { %v1629_v49 = vsel %vm1211_vm4, %v6069_v15, %v1627_v38  ;;  %v6076_v37 = vrot.slane %v6075_v59, %v4432_v43  ;;  %v1261_v55 = vsel %vm1217_vm7, %v1170_v8, %v4866_v27  ;;  %1696 = vrot.lane.b32.xlu1 %v1402_v52, %s4286_s2  ;;  %v6078_v22 = vrot.slane %v6077_v47, 3 }
 0x171   :  { %v1619_v6 = vsel %vm1215_vm6, %v6071_v16, %v1617_v58  ;;  %v1631_v7 = vsel %vm1213_vm5, %v6073_v0, %v1629_v49  ;;  %v6079_v12 = vrot.slane %v6055_v11, %v4432_v43  ;;  %v6080_v1 = vrot.slane %v4851_v42, %v4432_v43 }
 0x172   :  { %v1254_v26 = vsel %vm1217_vm7, %v6076_v37, %v6074_v33  ;;  %v1621_v4 = vsel %vm1217_vm7, %v1620_v40, %v1619_v6  ;;  %v1633_v60 = vsel %vm1215_vm6, %v6078_v22, %v1631_v7  ;;  %v6081_v17 = vrot.slane %v4814_v56, 9 }
 0x173   :  { %v5085_v57 = vsel %vm1219_vm10, %v6079_v12, %v1254_v26  ;;  %v5091_v24 = vsel %vm1219_vm10, %v6080_v1, %v1261_v55  ;;  %v1623_v8 = vsel %vm1219_vm10, %v1622_v51, %v1621_v4  ;;  %v1635_v27 = vsel %vm1217_vm7, %v1634_v3, %v1633_v60 }
 0x174   :  { %v1368_v52 = vrot.slane %v5085_v57, 1  ;;  %v1369_v40 = vrot.slane %v5091_v24, 1  ;;  %v1637_v38 = vsel %vm1219_vm10, %v1636_v31, %v1635_v27  ;;  %v1389_v11 = vrot.slane %v5085_v57, 2 }
 0x175   :  { %v1390_v35 = vrot.slane %v5091_v24, 2  ;;  %v886_v5 = vmax.f32 %v4814_v56, %v6081_v17  ;;  %v1668_v58 = vpack.c.b16 %v1637_v38, %v1623_v8  ;;  %v1354_v14 = vpack.c.bf16 %v4851_v42, %v4851_v42 }
 0x176   :  { %v1373_v51 = vsel %vm1371_vm14, %v1368_v52, %v1369_v40  ;;  %v1374_v3 = vsel %vm1371_vm14, %v1367_v10, %v1368_v52  ;;  %v1395_v31 = vsel %vm1392_vm13, %v1388_v32, %v1389_v11  ;;  %v6082_v10 = vpack.c.bf16 %v4826_v45, %v4826_v45 }
 0x177   :  { %v1382_v15 = vpack.c.bf16 %v1373_v51, %v1374_v3  ;;  %v1394_v49 = vsel %vm1392_vm13, %v1389_v11, %v1390_v35  ;;  %v1206_v61 = vrot.slane %v886_v5, %v4432_v43  ;;  %1674 = vrot.lane.b32.xlu0 %v1668_v58, %s4285_s0  ;;  %v1362_v16 = vpack.c.bf16 %v886_v5, %v886_v5 }
 0x178   :  { %v1403_v56 = vpack.c.bf16 %v1394_v49, %v1395_v31  ;;  %v1545_v6 = vunpack.c.l.b16 %v1354_v14  ;;  %v1552_v25 = vunpack.c.l.b16 %v6082_v10  ;;  %v6083_v42 = vrot.slane %v4805_v2, 6 }
 0x179   :  { %1686 = vrot.lane.b32.xlu1 %v1382_v15, %s4287_s13  ;;  %v1648_v32 = vrot.slane %v4871_v20, 2  ;;  %v6084_v7 = vrot.slane %v4788_v36, 6  ;;  %v6085_v59 = vrot.slane %v4826_v45, %v4432_v43  ;;  %v1553_v26 = vunpack.c.l.b16 %v1362_v16 }
 0x17a   :  { %v1641_v0 = vsel %vm1209_vm3, %v6083_v42, %v4817_v63  ;;  %v6086_v55 = vrot.slane %v4807_v44, 5  ;;  %v1650_v4 = vrot.slane %v1545_v6, 1  ;;  %v6087_v63 = vrot.slane %v4790_v13, 5  ;;  %v4174_v44 = vld [vmem:[%s5974_s3] sm:$0xff]  }
 0x17b   :  { %v1655_v33 = vsel %vm1209_vm3, %v6084_v7, %v4796_v53  ;;  %v1268_v37 = vsel %vm1217_vm7, %v6085_v59, %v4839_v30  ;;  %v6088_v36 = vrot.slane %v4861_v46, 4  ;;  %v6089_v47 = vrot.slane %v4836_v54, 4  ;;  %1698 = vrot.lane.b32.xlu0 %v1403_v56, %s4286_s2  ;;  %v4176_v56 = vld [vmem:[%s5974_s3 + $0x10] sm:$0xff]  }
 0x17c   :  { %v1643_v2 = vsel %vm1211_vm4, %v6086_v55, %v1641_v0  ;;  %v1657_v20 = vsel %vm1211_vm4, %v6087_v63, %v1655_v33  ;;  %v1662_v22 = vrot.slane %v1552_v25, 2  ;;  %v5146_v30 = vsel %vm1219_vm10, %v1206_v61, %v1268_v37 }
 0x17d   :  { %v1645_v53 = vsel %vm1213_vm5, %v6088_v36, %v1643_v2  ;;  %v1659_v45 = vsel %vm1213_vm5, %v6089_v47, %v1657_v20  ;;  %v6090_v13 = vrot.slane %v4868_v62, 3  ;;  %v6091_v60 = vrot.slane %v4841_v23, 3 }
 0x17e   :  { %v1664_v12 = vrot.slane %v1553_v26, 1  ;;  %v1370_v1 = vrot.slane %v5146_v30, 1  ;;  %v1391_v52 = vrot.slane %v5146_v30, 2  ;;  %v4288_v17 = vmov 0  }
 0x17f   :  { %v1647_v46 = vsel %vm1215_vm6, %v6090_v13, %v1645_v53  ;;  %v1661_v54 = vsel %vm1215_vm6, %v6091_v60, %v1659_v45  ;;  %1836 = vmatprep.subr.bf16.mxu1 %v4288_v17  ;;  %v1285_v15 = vrot.slane %v5146_v30, 7  ;;  %v1281_v49 = vrot.slane %v5012_v9, 7  ;;  %v4183_v13 = vld [vmem:[%s5974_s3 + $0x48] sm:$0xff]  }
 0x180   :  { %v1649_v8 = vsel %vm1217_vm7, %v1648_v32, %v1647_v46  ;;  %v1663_v27 = vsel %vm1217_vm7, %v1662_v22, %v1661_v54  ;;  %v1372_v62 = vsel %vm1371_vm14, %v1369_v40, %v1370_v1  ;;  %v1379_v23 = vsel %vm1371_vm14, %v1370_v1, %v1363_v21  ;;  %1837 = vmatpush1.bf16.msra.mxu1 %v4174_v44  ;;  %v4175_v40 = vld [vmem:[%s5974_s3 + $0x8] sm:$0xff]   ;;  %v4178_v22 = vld [vmem:[%s5974_s3 + $0x20] sm:$0xff]  }
 0x181   :  { %v1651_v38 = vsel %vm1219_vm10, %v1650_v4, %v1649_v8  ;;  %v1665_v11 = vsel %vm1219_vm10, %v1664_v12, %v1663_v27  ;;  %v1383_v58 = vpack.c.bf16 %v1379_v23, %v1372_v62  ;;  %v1393_v51 = vsel %vm1392_vm13, %v1390_v35, %v1391_v52  ;;  %1838 = vmatprep.subr.bf16.mxu1 %v4288_v17  ;;  %v4182_v44 = vld [vmem:[%s5974_s3 + $0x40] sm:$0xff]  }
 0x182   :  { %v1669_v5 = vpack.c.b16 %v1665_v11, %v1651_v38  ;;  %v1400_v3 = vsel %vm1392_vm13, %v1391_v52, %v1384_v18  ;;  %v1279_v21 = vrot.slane %v4881_v39, 7  ;;  %v1278_v18 = vrot.slane %v4914_v50, 7  ;;  %v4180_v50 = vld [vmem:[%s5974_s3 + $0x30] sm:$0xff]  }
 0x183   :  { %v1404_v14 = vpack.c.bf16 %v1400_v3, %v1393_v51  ;;  %1688 = vrot.lane.b32.xlu0 %v1383_v58, %s4287_s13  ;;  %v1280_v35 = vrot.slane %v4923_v19, 7  ;;  %v1408_v31 = vrot.slane %v5012_v9, 3  ;;  %v1409_v61 = vrot.slane %v5020_v48, 3 }
 0x184   :  { %1676 = vrot.lane.b32.xlu1 %v1669_v5, %s4285_s0  ;;  %v1282_v39 = vrot.slane %v5020_v48, 7  ;;  %1839 = vmatpush1.bf16.msra.mxu1 %v4175_v40  ;;  %v1293_v16 = vsel %vm1286_vm15, %v1278_v18, %v1279_v21  ;;  %v1294_v6 = vsel %vm1286_vm15, %v1285_v15, %v1278_v18  ;;  %v1283_v9 = vrot.slane %v5085_v57, 7 }
 0x185   :  { %v1292_v10 = vsel %vm1286_vm15, %v1279_v21, %v1280_v35  ;;  %1840 = vmatprep.subr.bf16.mxu1 %v4288_v17  ;;  %v1295_v25 = vpack.c.bf16 %v1293_v16, %v1294_v6  ;;  %v1291_v48 = vsel %vm1286_vm15, %v1280_v35, %v1281_v49  ;;  %v1417_v42 = vsel %vm1413_vm11, %v1408_v31, %v1409_v61  ;;  %v4188_v16 = vld [vmem:[%s5976_s5 + $0x50] sm:$0xff]  }
 0x186   :  { %v1418_v0 = vsel %vm1413_vm11, %v1407_v28, %v1408_v31  ;;  %v1296_v32 = vpack.c.bf16 %v1291_v48, %v1292_v10  ;;  %v1289_v33 = vsel %vm1286_vm15, %v1282_v39, %v1283_v9  ;;  %v1290_v59 = vsel %vm1286_vm15, %v1281_v49, %v1282_v39  ;;  %v4177_v28 = vld [vmem:[%s5974_s3 + $0x18] sm:$0xff]   ;;  %v4184_v31 = vld [vmem:[%s5976_s5 + $0x40] sm:$0xff]   ;;  %v4186_v39 = vld [vmem:[%s5976_s5 + $0x48] sm:$0xff]  }
 0x187   :  { %v1423_v7 = vpack.c.bf16 %v1417_v42, %v1418_v0  ;;  %v1297_v37 = vpack.c.bf16 %v1289_v33, %v1290_v59  ;;  %v1410_v26 = vrot.slane %v5085_v57, 3  ;;  %v1411_v55 = vrot.slane %v5091_v24, 3  ;;  %4005 = vmatprep.subr.bf16.mxu0 %v4184_v31  ;;  %v4189_v6 = vld [vmem:[%s5976_s5 + $0x10] sm:$0xff]   ;;  %v4190_v10 = vld [vmem:[%s5976_s5 + $0x58] sm:$0xff]   ;;  %v4193_v48 = vld [vmem:[%s5976_s5 + $0x20] sm:$0xff]  }
 0x188   :  { %1700 = vrot.lane.b32.xlu1 %v1404_v14, %s4286_s2  ;;  %v1284_v19 = vrot.slane %v5091_v24, 7  ;;  %1841 = vmatpush1.bf16.msra.mxu1 %v4176_v56  ;;  %v1412_v2 = vrot.slane %v5146_v30, 3  ;;  %v4179_v30 = vld [vmem:[%s5974_s3 + $0x28] sm:$0xff]  }
 0x189   :  { %1842 = vmatprep.subr.bf16.mxu1 %v4288_v17  ;;  %v1415_v4 = vsel %vm1413_vm11, %v1410_v26, %v1411_v55  ;;  %v1416_v63 = vsel %vm1413_vm11, %v1409_v61, %v1410_v26  ;;  %v4185_v61 = vld [vmem:[%s5976_s5] sm:$0xff]   ;;  %v4187_v56 = vld [vmem:[%s5976_s5 + $0x8] sm:$0xff]  }
 0x18a   :  { %v1287_v57 = vsel %vm1286_vm15, %v1284_v19, %v1285_v15  ;;  %v1288_v24 = vsel %vm1286_vm15, %v1283_v9, %v1284_v19  ;;  %v1424_v20 = vpack.c.bf16 %v1415_v4, %v1416_v63  ;;  %v1414_v53 = vsel %vm1413_vm11, %v1411_v55, %v1412_v2  ;;  %4006 = vmatpush3.bf16.msra.mxu0 %v4185_v61  ;;  %v4191_v9 = vld [vmem:[%s5976_s5 + $0x18] sm:$0xff]   ;;  %v4194_v42 = vld [vmem:[%s5976_s5 + $0x68] sm:$0xff]  }
 0x18b   :  { %v1298_v36 = vpack.c.bf16 %v1287_v57, %v1288_v24  ;;  %v1421_v47 = vsel %vm1413_vm11, %v1412_v2, %v1405_v41  ;;  %v4181_v41 = vld [vmem:[%s5974_s3 + $0x38] sm:$0xff]   ;;  %4007 = vmatprep.subr.bf16.mxu0 %v4186_v39  ;;  %v4195_v0 = vld [vmem:[%s5976_s5 + $0x28] sm:$0xff]  }
 0x18c   :  { %v1425_v45 = vpack.c.bf16 %v1421_v47, %v1414_v53  ;;  %1843 = vmatpush1.bf16.msra.mxu1 %v4177_v28  ;;  %v5321_v28 = vadd.s32 24, %v4412_v29 }
 0x18d   :  { %1844 = vmatprep.subr.bf16.mxu1 %v4288_v17 }
 0x18e   :  { %4008 = vmatpush3.bf16.msra.mxu0 %v4187_v56  ;;  %v1912_v47 = vand.u32 31, %v5321_v28 }
 0x18f   :  { %4009 = vmatprep.subr.bf16.mxu0 %v4188_v16 }
 0x190   :  { %1845 = vmatpush1.bf16.msra.mxu1 %v4178_v22  ;;  %vm5332_vm8 = vcmp.lt.s32.totalorder %v1912_v47, 28 }
 0x191   :  { %1846 = vmatprep.subr.bf16.mxu1 %v4288_v17 }
 0x192   :  { %4010 = vmatpush3.bf16.msra.mxu0 %v4189_v6 }
 0x193   :  { %4011 = vmatprep.subr.bf16.mxu0 %v4190_v10 }
 0x194   :  { %1847 = vmatpush1.bf16.msra.mxu1 %v4179_v30 }
 0x195   :  { %1848 = vmatprep.subr.bf16.mxu1 %v4288_v17 }
 0x196   :  { %4012 = vmatpush3.bf16.msra.mxu0 %v4191_v9 }
 0x198   :  { %1849 = vmatpush1.bf16.msra.mxu1 %v4180_v50 }
 0x199   :  { %1850 = vmatprep.subr.bf16.mxu1 %v4288_v17 }
 0x19c   :  { %1851 = vmatpush1.bf16.msra.mxu1 %v4181_v41 }
 0x19d   :  { %1852 = vmatprep.subr.bf16.mxu1 %v4288_v17 }
 0x1a0   :  { %1853 = vmatpush1.bf16.msra.mxu1 %v4182_v44 }
 0x1a1   :  { %1854 = vmatprep.subr.bf16.mxu1 %v4288_v17 }
 0x1a4   :  { %1855 = vmatpush1.bf16.msra.mxu1 %v4183_v13 }
 0x1d0   :  { %v1671_v46 = vpop.permute.xlu0 %1670 }
 0x1d1   :  { %v1705_v54 = vsel %vm1702_vm12, %v1295_v25, %v1671_v46  ;;  %v4192_v25 = vld [vmem:[%s5976_s5 + $0x60] sm:$0xff]  }
 0x1d2   :  { %v1695_v60 = vpop.permute.xlu1 %1694  ;;  %4013 = vmatprep.subr.bf16.mxu0 %v4192_v25 }
 0x1d3   :  { %4014 = vmatpush3.bf16.msra.mxu0 %v4193_v48 }
 0x1d4   :  { %v1683_v12 = vpop.permute.xlu0 %1682  ;;  %4015 = vmatprep.subr.bf16.mxu0 %v4194_v42 }
 0x1d5   :  { %v1717_v1 = vsel %vm1715_vm0, %v1705_v54, %v1683_v12 }
 0x1d6   :  { %v1726_v8 = vsel %vm1724_vm1, %v1717_v1, %v1695_v60  ;;  %v6092_v60 = vld [vmem:[#allocation5_spill] sm:$0xff] }
 0x1d7   :  { %1869 = vmatmul.mubr.bf16.vlgmr.msra.gmra.mrb[16].mxu1 %v1726_v8  ;;  %4016 = vmatpush3.bf16.msra.mxu0 %v4195_v0  ;;  %v1916_v54 = vand.u32 31, %v6092_v60 }
 0x1d8   :  { %3868 = vmatprep.mubr.msk.bf16.mxu1 %vm1702_vm12, %v1423_v7 }
 0x1d9   :  { %vm5456_vm9 = vcmp.lt.s32.totalorder %v1916_v54, 28 }
 0x1de   :  { %v1673_v27 = vpop.permute.xlu1 %1672 }
 0x1df   :  { %v1708_v52 = vsel %vm1702_vm12, %v1296_v32, %v1673_v27  ;;  %v5316_v32 = vld [vmem:[%s5975_s4] ss:$0 sm:$0xff] }
 0x1e0   :  { %v1685_v38 = vpop.permute.xlu0 %1684 }
 0x1e1   :  { %v1719_v11 = vsel %vm1715_vm0, %v1708_v52, %v1685_v38 }
 0x1e2   :  { %v1697_v62 = vpop.permute.xlu1 %1696 }
 0x1e3   :  { %v1729_v23 = vsel %vm1724_vm1, %v1719_v11, %v1697_v62 }
 0x1e4   :  { %1877 = vmatmul.mubr.bf16.gmra.mrb[20].mxu1 %v1729_v23 }
 0x1e5   :  { %3869 = vmatprep.mubr.msk.bf16.mxu1 %vm1702_vm12, %v1424_v20 }
 0x1e9   :  { %v1675_v17 = vpop.permute.xlu0 %1674 }
 0x1ea   :  { %v1711_v5 = vsel %vm1702_vm12, %v1297_v37, %v1675_v17 }
 0x1eb   :  { %v1687_v58 = vpop.permute.xlu1 %1686 }
 0x1ec   :  { %v1721_v51 = vsel %vm1715_vm0, %v1711_v5, %v1687_v58 }
 0x1ed   :  { %v1699_v3 = vpop.permute.xlu0 %1698 }
 0x1ee   :  { %v1732_v40 = vsel %vm1724_vm1, %v1721_v51, %v1699_v3 }
 0x1ef   :  { %1885 = vmatmul.mubr.bf16.gmra.mrb[24].mxu1 %v1732_v40 }
 0x1f0   :  { %3870 = vmatprep.mubr.msk.bf16.mxu1 %vm1702_vm12, %v1425_v45 }
 0x1f5   :  { %v1689_v15 = vpop.permute.xlu0 %1688 }
 0x1f6   :  { %v1677_v14 = vpop.permute.xlu1 %1676 }
 0x1f7   :  { %v1714_v21 = vsel %vm1702_vm12, %v1298_v36, %v1677_v14 }
 0x1f8   :  { %v1723_v18 = vsel %vm1715_vm0, %v1714_v21, %v1689_v15 }
 0x1fa   :  { %v1701_v35 = vpop.permute.xlu1 %1700 }
 0x1fb   :  { %v1735_v49 = vsel %vm1724_vm1, %v1723_v18, %v1701_v35 }
 0x1fc   :  { %1893 = vmatmul.mubr.bf16.gmra.mrb[28].mxu1 %v1735_v49 }
 0x2aa   :  { %v1870_v7 = vpop.f32.mrb[16].mxu1 }
 0x2ab   :  { %v1871_v33 = vadd.f32 %v5316_v32, %v1870_v7  ;;  %v1872_v59 = vpop.f32.mrb[17].mxu1 }
 0x2ac   :  { %v1873_v37 = vpop.f32.mrb[18].mxu1 }
 0x2ad   :  { %v1901_v26 = vmax.f32 %v1871_v33, 0.0  ;;  %v1874_v55 = vadd.f32 %v5316_v32, %v1873_v37  ;;  %v1875_v19 = vpop.f32.mrb[19].mxu1 }
 0x2af   :  { %v1941_v2 = vcombine.high %v1901_v26, %v1901_v26  ;;  %v1948_v4 = vrot.slane %v1901_v26, %v4421_v34  ;;  %v1902_v63 = vmax.f32 %v1874_v55, 0.0 }
 0x2b1   :  { %v1955_v57 = vrot.slane %v1941_v2, %v4421_v34  ;;  %v1956_v24 = vcombine.high %v1948_v4, %v1948_v4  ;;  %v3871_v20 = vrot.slane %v1948_v4, 9  ;;  %v1958_v36 = vcombine.high %v1902_v63, %v1902_v63 }
 0x2b2   :  { %v1965_v53 = vrot.slane %v1902_v63, %v4421_v34 }
 0x2b3   :  { %v1957_v45 = vcombine.high %v1955_v57, %v1955_v57  ;;  %v3872_v22 = vrot.slane %v1956_v24, 9  ;;  %v3873_v30 = vrot.slane %v1955_v57, 9  ;;  %v2205_v50 = vmax.f32 %v1948_v4, %v3871_v20 }
 0x2b4   :  { %v1972_v41 = vrot.slane %v1958_v36, %v4421_v34  ;;  %v1973_v44 = vcombine.high %v1965_v53, %v1965_v53  ;;  %v3875_v13 = vrot.slane %v1965_v53, 9 }
 0x2b5   :  { %v3874_v12 = vrot.slane %v1957_v45, 9  ;;  %v2206_v1 = vmax.f32 %v1956_v24, %v3872_v22  ;;  %v2207_v8 = vmax.f32 %v1955_v57, %v3873_v30  ;;  %v2272_v27 = vrot.slane %v2205_v50, %v4432_v43 }
 0x2b6   :  { %v2439_v38 = vpack.c.bf16 %v2205_v50, %v2205_v50  ;;  %v1974_v11 = vcombine.high %v1972_v41, %v1972_v41  ;;  %v3876_v62 = vrot.slane %v1973_v44, 9  ;;  %v3877_v23 = vrot.slane %v1972_v41, 9 }
 0x2b7   :  { %v1878_v46 = vpop.f32.mrb[20].mxu1  ;;  %v2208_v5 = vmax.f32 %v1957_v45, %v3874_v12  ;;  %v2276_v58 = vrot.slane %v2206_v1, %v4432_v43  ;;  %v2280_v51 = vrot.slane %v2207_v8, %v4432_v43  ;;  %v2440_v3 = vpack.c.bf16 %v2206_v1, %v2206_v1 }
 0x2b8   :  { %v1880_v52 = vpop.f32.mrb[21].mxu1  ;;  %v2441_v14 = vpack.c.bf16 %v2207_v8, %v2207_v8  ;;  %v2533_v21 = vunpack.c.l.b16 %v2439_v38  ;;  %v3878_v15 = vrot.slane %v1974_v11, 9  ;;  %v2209_v18 = vmax.f32 %v1965_v53, %v3875_v13 }
 0x2b9   :  { %v1881_v17 = vpop.f32.mrb[22].mxu1  ;;  %v2284_v49 = vrot.slane %v2208_v5, %v4432_v43  ;;  %v2397_v31 = vsel %vm1207_vm2, %v2276_v58, %v2272_v27  ;;  %v2442_v61 = vpack.c.bf16 %v2208_v5, %v2208_v5  ;;  %v2534_v39 = vunpack.c.l.b16 %v2440_v3 }
 0x2ba   :  { %v1883_v40 = vpop.f32.mrb[23].mxu1  ;;  %v2398_v56 = vsel %vm1209_vm3, %v2280_v51, %v2397_v31  ;;  %v2535_v16 = vunpack.c.l.b16 %v2441_v14  ;;  %v2210_v6 = vmax.f32 %v1973_v44, %v3876_v62  ;;  %v5339_v10 = vmax.f32 %v1972_v41, %v3877_v23 }
 0x2bb   :  { %v5341_v9 = vunpack.c.l.b16 %v2442_v61  ;;  %v2565_v25 = vrot.slane %v2534_v39, 7  ;;  %v5343_v48 = vmax.f32 %v1974_v11, %v3878_v15  ;;  %v2288_v42 = vrot.slane %v2209_v18, %v4432_v43 }
 0x2bc   :  { %v2567_v0 = vrot.slane %v2535_v16, 6  ;;  %v2292_v7 = vrot.slane %v2210_v6, %v4432_v43  ;;  %v2296_v33 = vrot.slane %v5339_v10, %v4432_v43  ;;  %v2399_v59 = vsel %vm1211_vm4, %v2284_v49, %v2398_v56 }
 0x2bd   :  { %v2566_v37 = vsel %vm1207_vm2, %v2565_v25, %v2533_v21  ;;  %v2569_v26 = vrot.slane %v5341_v9, 5  ;;  %v2300_v55 = vrot.slane %v5343_v48, %v4432_v43  ;;  %v2400_v19 = vsel %vm1213_vm5, %v2288_v42, %v2399_v59 }
 0x2be   :  { %v5356_v4 = vsel %vm1215_vm6, %v2292_v7, %v2400_v19  ;;  %v2443_v63 = vpack.c.bf16 %v2209_v18, %v2209_v18  ;;  %v2444_v57 = vpack.c.bf16 %v2210_v6, %v2210_v6  ;;  %v2445_v24 = vpack.c.bf16 %v5339_v10, %v5339_v10 }
 0x2bf   :  { %v1879_v36 = vadd.f32 %v5316_v32, %v1878_v46  ;;  %v1882_v53 = vadd.f32 %v5316_v32, %v1881_v17  ;;  %v2446_v22 = vpack.c.bf16 %v5343_v48, %v5343_v48  ;;  %v5379_v11 = vsel %vm1209_vm3, %v2567_v0, %v2566_v37 }
 0x2c0   :  { %v5365_v30 = vunpack.c.l.b16 %v2443_v63  ;;  %v5367_v50 = vunpack.c.l.b16 %v2444_v57  ;;  %v5369_v41 = vunpack.c.l.b16 %v2445_v24 }
 0x2c1   :  { %v1903_v12 = vmax.f32 %v1879_v36, 0.0  ;;  %v1904_v1 = vmax.f32 %v1882_v53, 0.0  ;;  %v5372_v8 = vunpack.c.l.b16 %v2446_v22 }
 0x2c2   :  { %v1886_v2 = vpop.f32.mrb[24].mxu1  ;;  %v2571_v27 = vrot.slane %v5365_v30, 4  ;;  %v2573_v52 = vrot.slane %v5367_v50, 3 }
 0x2c3   :  { %v1888_v20 = vpop.f32.mrb[25].mxu1  ;;  %v1887_v47 = vadd.f32 %v5316_v32, %v1886_v2  ;;  %v1975_v62 = vcombine.high %v1903_v12, %v1903_v12  ;;  %v1982_v23 = vrot.slane %v1903_v12, %v4421_v34  ;;  %v1928_v17 = vsel %vm5332_vm8, %v1904_v1, 0.0 }
 0x2c4   :  { %v1889_v45 = vpop.f32.mrb[26].mxu1  ;;  %v1992_v58 = vcombine.high %v1928_v17, %v1928_v17  ;;  %v1999_v51 = vrot.slane %v1928_v17, %v4421_v34 }
 0x2c5   :  { %v1890_v44 = vadd.f32 %v5316_v32, %v1889_v45  ;;  %v1891_v13 = vpop.f32.mrb[27].mxu1  ;;  %v1905_v46 = vmax.f32 %v1887_v47, 0.0  ;;  %v1989_v14 = vrot.slane %v1975_v62, %v4421_v34  ;;  %v1990_v21 = vcombine.high %v1982_v23, %v1982_v23 }
 0x2c6   :  { %v3879_v15 = vrot.slane %v1982_v23, 9  ;;  %v2006_v35 = vrot.slane %v1992_v58, %v4421_v34  ;;  %v2007_v49 = vcombine.high %v1999_v51, %v1999_v51  ;;  %v3883_v31 = vrot.slane %v1999_v51, 9 }
 0x2c7   :  { %v5376_v38 = vmax.f32 %v1890_v44, 0.0  ;;  %v2009_v5 = vcombine.high %v1905_v46, %v1905_v46  ;;  %v5386_v3 = vrot.slane %v1905_v46, %v4421_v34  ;;  %v1991_v56 = vcombine.high %v1989_v14, %v1989_v14 }
 0x2c8   :  { %v3880_v16 = vrot.slane %v1990_v21, 9  ;;  %v3881_v6 = vrot.slane %v1989_v14, 9  ;;  %v2213_v25 = vmax.f32 %v1982_v23, %v3879_v15  ;;  %v5397_v0 = vcombine.high %v2006_v35, %v2006_v35 }
 0x2c9   :  { %v2026_v40 = vcombine.high %v5376_v38, %v5376_v38  ;;  %v5392_v18 = vrot.slane %v2009_v5, %v4421_v34  ;;  %v2024_v61 = vcombine.high %v5386_v3, %v5386_v3  ;;  %v3884_v7 = vrot.slane %v2007_v49, 9 }
 0x2ca   :  { %v3885_v59 = vrot.slane %v2006_v35, 9  ;;  %v2217_v37 = vmax.f32 %v1999_v51, %v3883_v31  ;;  %v3882_v2 = vrot.slane %v1991_v56, 9  ;;  %v2214_v63 = vmax.f32 %v1990_v21, %v3880_v16 }
 0x2cb   :  { %v2215_v57 = vmax.f32 %v1989_v14, %v3881_v6  ;;  %v2304_v24 = vrot.slane %v2213_v25, %v4432_v43  ;;  %v2447_v36 = vpack.c.bf16 %v2213_v25, %v2213_v25  ;;  %v3886_v53 = vrot.slane %v5397_v0, 9 }
 0x2cc   :  { %v2218_v47 = vmax.f32 %v2007_v49, %v3884_v7  ;;  %v5403_v45 = vmax.f32 %v2006_v35, %v3885_v59  ;;  %v2216_v22 = vmax.f32 %v1991_v56, %v3882_v2  ;;  %v2308_v44 = vrot.slane %v2214_v63, %v4432_v43 }
 0x2cd   :  { %v2312_v13 = vrot.slane %v2215_v57, %v4432_v43  ;;  %v2448_v12 = vpack.c.bf16 %v2214_v63, %v2214_v63  ;;  %v2449_v1 = vpack.c.bf16 %v2215_v57, %v2215_v57  ;;  %v2541_v46 = vunpack.c.l.b16 %v2447_v36 }
 0x2ce   :  { %v2320_v62 = vrot.slane %v2217_v37, %v4432_v43  ;;  %v2324_v23 = vrot.slane %v2218_v47, %v4432_v43  ;;  %v2316_v17 = vrot.slane %v2216_v22, %v4432_v43  ;;  %v2404_v5 = vsel %vm1207_vm2, %v2308_v44, %v2304_v24 }
 0x2cf   :  { %v1894_v39 = vpop.f32.mrb[28].mxu1  ;;  %v2450_v58 = vpack.c.bf16 %v2216_v22, %v2216_v22  ;;  %v2542_v51 = vunpack.c.l.b16 %v2448_v12  ;;  %v2405_v14 = vsel %vm1209_vm3, %v2312_v13, %v2404_v5  ;;  %v5412_v21 = vunpack.c.l.b16 %v2449_v1 }
 0x2d0   :  { %v1896_v42 = vpop.f32.mrb[29].mxu1  ;;  %v2328_v15 = vrot.slane %v5403_v45, %v4432_v43  ;;  %v2451_v35 = vpack.c.bf16 %v2217_v37, %v2217_v37  ;;  %v2406_v56 = vsel %vm1211_vm4, %v2316_v17, %v2405_v14  ;;  %v2452_v16 = vpack.c.bf16 %v2218_v47, %v2218_v47 }
 0x2d1   :  { %v5399_v19 = vpop.f32.mrb[30].mxu1  ;;  %v5416_v49 = vunpack.c.l.b16 %v2450_v58  ;;  %v2579_v31 = vrot.slane %v2542_v51, 7  ;;  %v2581_v6 = vrot.slane %v5412_v21, 6  ;;  %v2407_v25 = vsel %vm1213_vm5, %v2320_v62, %v2406_v56 }
 0x2d2   :  { %v1899_v20 = vpop.f32.mrb[31].mxu1  ;;  %v2453_v42 = vpack.c.bf16 %v5403_v45, %v5403_v45  ;;  %v5423_v7 = vunpack.c.l.b16 %v2451_v35  ;;  %v5430_v2 = vsel %vm1215_vm6, %v2324_v23, %v2407_v25  ;;  %v5432_v63 = vunpack.c.l.b16 %v2452_v16 }
 0x2d3   :  { %v5426_v59 = vsel %vm1207_vm2, %v2579_v31, %v2541_v46  ;;  %v2583_v37 = vrot.slane %v5416_v49, 5  ;;  %v2025_v24 = vcombine.high %v5392_v18, %v5392_v18  ;;  %v3887_v20 = vrot.slane %v5386_v3, 9 }
 0x2d4   :  { %v2585_v57 = vrot.slane %v5423_v7, 4  ;;  %v3888_v36 = vrot.slane %v2024_v61, 9  ;;  %v3889_v22 = vrot.slane %v5392_v18, 9  ;;  %v2033_v44 = vrot.slane %v5376_v38, %v4421_v34 }
 0x2d5   :  { %v2040_v13 = vrot.slane %v2026_v40, %v4421_v34  ;;  %v3890_v12 = vrot.slane %v2025_v24, 9  ;;  %v2221_v1 = vmax.f32 %v5386_v3, %v3887_v20  ;;  %v1895_v62 = vadd.f32 %v5316_v32, %v1894_v39 }
 0x2d6   :  { %v2222_v46 = vmax.f32 %v2024_v61, %v3888_v36  ;;  %v2223_v23 = vmax.f32 %v5392_v18, %v3889_v22  ;;  %v2041_v17 = vcombine.high %v2033_v44, %v2033_v44  ;;  %v3891_v58 = vrot.slane %v2033_v44, 9 }
 0x2d7   :  { %v2042_v5 = vcombine.high %v2040_v13, %v2040_v13  ;;  %v2224_v51 = vmax.f32 %v2025_v24, %v3890_v12  ;;  %v2336_v14 = vrot.slane %v2221_v1, %v4432_v43  ;;  %v2455_v31 = vpack.c.bf16 %v2221_v1, %v2221_v1 }
 0x2d8   :  { %v2340_v35 = vrot.slane %v2222_v46, %v4432_v43  ;;  %v2344_v38 = vrot.slane %v2223_v23, %v4432_v43  ;;  %v2456_v40 = vpack.c.bf16 %v2222_v46, %v2222_v46  ;;  %v2457_v56 = vpack.c.bf16 %v2223_v23, %v2223_v23 }
 0x2d9   :  { %v3892_v16 = vrot.slane %v2041_v17, 9  ;;  %v2348_v3 = vrot.slane %v2224_v51, %v4432_v43  ;;  %v2458_v39 = vpack.c.bf16 %v2224_v51, %v2224_v51  ;;  %v2549_v18 = vunpack.c.l.b16 %v2455_v31 }
 0x2da   :  { %v2411_v61 = vsel %vm1207_vm2, %v2340_v35, %v2336_v14  ;;  %v2550_v20 = vunpack.c.l.b16 %v2456_v40  ;;  %v5461_v36 = vunpack.c.l.b16 %v2457_v56  ;;  %v3893_v22 = vrot.slane %v2040_v13, 9 }
 0x2db   :  { %v2412_v24 = vsel %vm1209_vm3, %v2344_v38, %v2411_v61  ;;  %v5463_v12 = vunpack.c.l.b16 %v2458_v39  ;;  %v3894_v1 = vrot.slane %v2042_v5, 9  ;;  %v2225_v46 = vmax.f32 %v2033_v44, %v3891_v58 }
 0x2dc   :  { %v2226_v23 = vmax.f32 %v2041_v17, %v3892_v16  ;;  %v2593_v14 = vrot.slane %v2550_v20, 7  ;;  %v5466_v35 = vmax.f32 %v2040_v13, %v3893_v22  ;;  %v2413_v60 = vsel %vm1211_vm4, %v2348_v3, %v2412_v24 }
 0x2dd   :  { %v5470_v31 = vmax.f32 %v2042_v5, %v3894_v1  ;;  %v2352_v38 = vrot.slane %v2225_v46, %v4432_v43  ;;  %v2459_v17 = vpack.c.bf16 %v2225_v46, %v2225_v46  ;;  %v1907_v3 = vmax.f32 %v1895_v62, 0.0 }
 0x2de   :  { %v2356_v40 = vrot.slane %v2226_v23, %v4432_v43  ;;  %v5475_v56 = vsel %vm1207_vm2, %v2593_v14, %v2549_v18  ;;  %v2460_v58 = vpack.c.bf16 %v2226_v23, %v2226_v23  ;;  %v2461_v5 = vpack.c.bf16 %v5466_v35, %v5466_v35 }
 0x2df   :  { %v2414_v16 = vsel %vm1213_vm5, %v2352_v38, %v2413_v60  ;;  %v5487_v39 = vunpack.c.l.b16 %v2459_v17  ;;  %v1898_v24 = vadd.f32 %v5316_v32, %v5399_v19  ;;  %v2043_v22 = vcombine.high %v1907_v3, %v1907_v3 }
 0x2e0   :  { %v5485_v61 = vsel %vm1215_vm6, %v2356_v40, %v2414_v16  ;;  %v5489_v18 = vunpack.c.l.b16 %v2460_v58  ;;  %v5493_v20 = vunpack.c.l.b16 %v2461_v5  ;;  %v2050_v1 = vrot.slane %v1907_v3, %v4421_v34 }
 0x2e1   :  { %v5499_v46 = vmax.f32 %v5397_v0, %v3886_v53  ;;  %v1908_v14 = vmax.f32 %v1898_v24, 0.0  ;;  %v5506_v60 = vunpack.c.l.b16 %v2453_v42  ;;  %v2057_v32 = vrot.slane %v2043_v22, %v4421_v34 }
 0x2e2   :  { %v2058_v19 = vcombine.high %v2050_v1, %v2050_v1  ;;  %v3895_v38 = vrot.slane %v2050_v1, 9  ;;  %v2570_v17 = vsel %vm1211_vm4, %v2569_v26, %v5379_v11  ;;  %v2575_v42 = vrot.slane %v5369_v41, 2 }
 0x2e3   :  { %v1932_v0 = vsel %vm5456_vm9, %v1908_v14, 0.0  ;;  %v2454_v53 = vpack.c.bf16 %v5499_v46, %v5499_v46  ;;  %v2059_v58 = vcombine.high %v2057_v32, %v2057_v32  ;;  %v3897_v5 = vrot.slane %v2057_v32, 9 }
 0x2e4   :  { %v3896_v16 = vrot.slane %v2058_v19, 9  ;;  %v2229_v3 = vmax.f32 %v2050_v1, %v3895_v38  ;;  %v2060_v24 = vcombine.high %v1932_v0, %v1932_v0  ;;  %v2067_v22 = vrot.slane %v1932_v0, %v4421_v34 }
 0x2e5   :  { %v5521_v23 = vunpack.c.l.b16 %v2454_v53  ;;  %v2572_v25 = vsel %vm1213_vm5, %v2571_v27, %v2570_v17  ;;  %v3898_v14 = vrot.slane %v2059_v58, 9  ;;  %v2231_v9 = vmax.f32 %v2057_v32, %v3897_v5 }
 0x2e6   :  { %v2230_v62 = vmax.f32 %v2058_v19, %v3896_v16  ;;  %v2368_v26 = vrot.slane %v2229_v3, %v4432_v43  ;;  %v2463_v11 = vpack.c.bf16 %v2229_v3, %v2229_v3  ;;  %v2074_v54 = vrot.slane %v2060_v24, %v4421_v34 }
 0x2e7   :  { %v2075_v51 = vcombine.high %v2067_v22, %v2067_v22  ;;  %v3899_v13 = vrot.slane %v2067_v22, 9  ;;  %v2232_v1 = vmax.f32 %v2059_v58, %v3898_v14  ;;  %v2376_v0 = vrot.slane %v2231_v9, %v4432_v43 }
 0x2e8   :  { %v2372_v38 = vrot.slane %v2230_v62, %v4432_v43  ;;  %v2464_v53 = vpack.c.bf16 %v2230_v62, %v2230_v62  ;;  %v2465_v40 = vpack.c.bf16 %v2231_v9, %v2231_v9  ;;  %v2557_v30 = vunpack.c.l.b16 %v2463_v11  ;;  %v4196_v11 = vld [vmem:[%s5976_s5 + $0x70] sm:$0xff]  }
 0x2e9   :  { %v2076_v47 = vcombine.high %v2074_v54, %v2074_v54  ;;  %v3900_v27 = vrot.slane %v2075_v51, 9  ;;  %v2380_v19 = vrot.slane %v2232_v1, %v4432_v43  ;;  %v2466_v17 = vpack.c.bf16 %v2232_v1, %v2232_v1  ;;  %4017 = vmatprep.subr.bf16.mxu0 %v4196_v11 }
 0x2ea   :  { %v2418_v32 = vsel %vm1207_vm2, %v2372_v38, %v2368_v26  ;;  %v2558_v16 = vunpack.c.l.b16 %v2464_v53  ;;  %v5533_v3 = vunpack.c.l.b16 %v2465_v40  ;;  %v3901_v58 = vrot.slane %v2074_v54, 9  ;;  %v4197_v26 = vld [vmem:[%s5976_s5 + $0x30] sm:$0xff]   ;;  %v4198_v40 = vld [vmem:[%s5976_s5 + $0x78] sm:$0xff]  }
 0x2eb   :  { %v2419_v5 = vsel %vm1209_vm3, %v2376_v0, %v2418_v32  ;;  %v3902_v24 = vrot.slane %v2076_v47, 9  ;;  %v5535_v14 = vunpack.c.l.b16 %v2466_v17  ;;  %v2233_v62 = vmax.f32 %v2067_v22, %v3899_v13  ;;  %4018 = vmatpush3.bf16.msra.mxu0 %v4197_v26 }
 0x2ec   :  { %v2607_v44 = vrot.slane %v2558_v16, 7  ;;  %v2234_v9 = vmax.f32 %v2075_v51, %v3900_v27  ;;  %v2235_v38 = vmax.f32 %v2074_v54, %v3901_v58  ;;  %v2420_v53 = vsel %vm1211_vm4, %v2380_v19, %v2419_v5  ;;  %4019 = vmatprep.subr.bf16.mxu0 %v4198_v40  ;;  %v5567_v5 = vld [vmem:[%s5976_s5 + $0x80] sm:$0xff]  }
 0x2ed   :  { %v2236_v0 = vmax.f32 %v2076_v47, %v3902_v24  ;;  %v2611_v13 = vrot.slane %v5535_v14, 5  ;;  %v2384_v22 = vrot.slane %v2233_v62, %v4432_v43  ;;  %v2467_v16 = vpack.c.bf16 %v2233_v62, %v2233_v62  ;;  %v4199_v47 = vld [vmem:[%s5976_s5 + $0x38] sm:$0xff]  }
 0x2ee   :  { %v5549_v51 = vsel %vm1207_vm2, %v2607_v44, %v2557_v30  ;;  %v2388_v27 = vrot.slane %v2234_v9, %v4432_v43  ;;  %v2392_v32 = vrot.slane %v2235_v38, %v4432_v43  ;;  %v2468_v1 = vpack.c.bf16 %v2234_v9, %v2234_v9 }
 0x2ef   :  { %v2396_v17 = vrot.slane %v2236_v0, %v4432_v43  ;;  %v2421_v54 = vsel %vm1213_vm5, %v2384_v22, %v2420_v53  ;;  %v2469_v44 = vpack.c.bf16 %v2235_v38, %v2235_v38  ;;  %v2574_v30 = vsel %vm1215_vm6, %v2573_v52, %v2572_v25  ;;  %4020 = vmatpush3.bf16.msra.mxu0 %v4199_v47 }
 0x2f0   :  { %v2577_v19 = vrot.slane %v5372_v8, 1  ;;  %v2422_v58 = vsel %vm1215_vm6, %v2388_v27, %v2421_v54  ;;  %v2561_v24 = vunpack.c.l.b16 %v2467_v16  ;;  %v2562_v62 = vunpack.c.l.b16 %v2468_v1  ;;  %4132 = vmatprep.subr.bf16.mxu0 %v5567_v5 }
 0x2f1   :  { %v2576_v9 = vsel %vm1217_vm7, %v2575_v42, %v2574_v30  ;;  %v2582_v8 = vsel %vm1209_vm3, %v2581_v6, %v5426_v59  ;;  %v2589_v52 = vrot.slane %v5506_v60, 2  ;;  %v2591_v25 = vrot.slane %v5521_v23, 1 }
 0x2f2   :  { %v2578_v50 = vsel %vm1219_vm10, %v2577_v19, %v2576_v9  ;;  %v2613_v11 = vrot.slane %v2561_v24, 4  ;;  %v2615_v26 = vrot.slane %v2562_v62, 3  ;;  %v2584_v40 = vsel %vm1211_vm4, %v2583_v37, %v2582_v8 }
 0x2f3   :  { %v2402_v41 = vsel %vm1217_vm7, %v2296_v33, %v5356_v4  ;;  %v2586_v21 = vsel %vm1213_vm5, %v2585_v57, %v2584_v40  ;;  %v2409_v49 = vsel %vm1217_vm7, %v2328_v15, %v5430_v2  ;;  %v6097_v10 = vrot.slane %v5466_v35, %v4432_v43 }
 0x2f4   :  { %v5595_v6 = vsel %vm1219_vm10, %v2300_v55, %v2402_v41  ;;  %v6098_v4 = vrot.slane %v5432_v63, 3  ;;  %v6099_v55 = vrot.slane %v5499_v46, %v4432_v43  ;;  %v6100_v45 = vrot.slane %v5470_v31, %v4432_v43 }
 0x2f5   :  { %v2416_v33 = vsel %vm1217_vm7, %v6097_v10, %v5485_v61  ;;  %v2481_v59 = vrot.slane %v5595_v6, 2  ;;  %v2423_v57 = vsel %vm1217_vm7, %v2392_v32, %v2422_v58  ;;  %v2462_v43 = vpack.c.bf16 %v5470_v31, %v5470_v31 }
 0x2f6   :  { %v2588_v48 = vsel %vm1215_vm6, %v6098_v4, %v2586_v21  ;;  %v5615_v7 = vsel %vm1219_vm10, %v6099_v55, %v2409_v49  ;;  %v5621_v15 = vsel %vm1219_vm10, %v6100_v45, %v2416_v33  ;;  %v5630_v61 = vsel %vm1219_vm10, %v2396_v17, %v2423_v57 }
 0x2f7   :  { %v2590_v37 = vsel %vm1217_vm7, %v2589_v52, %v2588_v48  ;;  %v2482_v2 = vrot.slane %v5615_v7, 2  ;;  %v2483_v63 = vrot.slane %v5621_v15, 2  ;;  %v2470_v46 = vpack.c.bf16 %v2236_v0, %v2236_v0 }
 0x2f8   :  { %v2592_v35 = vsel %vm1219_vm10, %v2591_v25, %v2590_v37  ;;  %v2484_v1 = vrot.slane %v5630_v61, 2  ;;  %v2494_v53 = vrot.slane %v5630_v61, 3  ;;  %v2556_v22 = vunpack.c.l.b16 %v2462_v43 }
 0x2f9   :  { %v2621_v23 = vpack.c.b16 %v2592_v35, %v2578_v50  ;;  %v2486_v60 = vsel %vm1392_vm13, %v2482_v2, %v2483_v63  ;;  %v2487_v42 = vsel %vm1392_vm13, %v2481_v59, %v2482_v2  ;;  %v2563_v27 = vunpack.c.l.b16 %v2469_v44 }
 0x2fa   :  { %v2489_v38 = vpack.c.bf16 %v2486_v60, %v2487_v42  ;;  %v2485_v31 = vsel %vm1392_vm13, %v2483_v63, %v2484_v1  ;;  %v2488_v0 = vsel %vm1392_vm13, %v2484_v1, %v2481_v59  ;;  %v2564_v32 = vunpack.c.l.b16 %v2470_v46 }
 0x2fb   :  { %2623 = vrot.lane.b32.xlu1 %v2621_v23, %s4287_s13  ;;  %v6101_v17 = vrot.slane %v5461_v36, 6  ;;  %v2490_v47 = vpack.c.bf16 %v2488_v0, %v2485_v31  ;;  %v6102_v54 = vrot.slane %v5463_v12, 5  ;;  %v2603_v30 = vrot.slane %v5493_v20, 2 }
 0x2fc   :  { %2629 = vrot.lane.b32.xlu0 %v2489_v38, %s4287_s13  ;;  %v2605_v19 = vrot.slane %v2556_v22, 1  ;;  %v6103_v58 = vrot.slane %v5487_v39, 4  ;;  %v6104_v62 = vrot.slane %v5533_v3, 6  ;;  %v2619_v9 = vrot.slane %v2564_v32, 1  ;;  %v4202_v32 = vld [vmem:[%s5976_s5 + $0x90] sm:$0xff]  }
 0x2fd   :  { %v2596_v16 = vsel %vm1209_vm3, %v6101_v17, %v5475_v56  ;;  %v2617_v56 = vrot.slane %v2563_v27, 2  ;;  %v6105_v50 = vrot.slane %v5489_v18, 3  ;;  %v2471_v8 = vrot.slane %v5595_v6, 1 }
 0x2fe   :  { %v2598_v44 = vsel %vm1211_vm4, %v6102_v54, %v2596_v16  ;;  %v2610_v36 = vsel %vm1209_vm3, %v6104_v62, %v5549_v51  ;;  %v2472_v39 = vrot.slane %v5615_v7, 1  ;;  %v2473_v51 = vrot.slane %v5621_v15, 1  ;;  %v4203_v16 = vld [vmem:[%s5976_s5 + $0x98] sm:$0xff]   ;;  %v4205_v54 = vld [vmem:[%s5978_s7] sm:$0xff]   ;;  %v4211_v62 = vld [vmem:[%s5978_s7 + $0x50] sm:$0xff]  }
 0x2ff   :  { %v2600_v24 = vsel %vm1213_vm5, %v6103_v58, %v2598_v44  ;;  %v2612_v20 = vsel %vm1211_vm4, %v2611_v13, %v2610_v36  ;;  %v2429_v25 = vrot.slane %v5595_v6, 7  ;;  %v2430_v40 = vrot.slane %v5615_v7, 7  ;;  %v4206_v44 = vld [vmem:[%s5978_s7 + $0xc0] sm:$0xff]   ;;  %v4209_v58 = vld [vmem:[%s5978_s7 + $0x8] sm:$0xff]  }
 0x300   :  { %v2602_v12 = vsel %vm1215_vm6, %v6105_v50, %v2600_v24  ;;  %v2614_v3 = vsel %vm1213_vm5, %v2613_v11, %v2612_v20  ;;  %2631 = vrot.lane.b32.xlu0 %v2490_v47, %s4287_s13  ;;  %v2477_v13 = vsel %vm1371_vm14, %v2471_v8, %v2472_v39  ;;  %v2476_v11 = vsel %vm1371_vm14, %v2472_v39, %v2473_v51  ;;  %v4210_v24 = vld [vmem:[%s5978_s7 + $0xc8] sm:$0xff]   ;;  %v4215_v50 = vld [vmem:[%s5978_s7 + $0x58] sm:$0xff]   ;;  %v4219_v39 = vld [vmem:[%s5978_s7 + $0x60] sm:$0xff]  }
 0x301   :  { %v2604_v52 = vsel %vm1217_vm7, %v2603_v30, %v2602_v12  ;;  %v2616_v14 = vsel %vm1215_vm6, %v2615_v26, %v2614_v3  ;;  %v2432_v21 = vrot.slane %v5630_v61, 7  ;;  %v2474_v49 = vrot.slane %v5630_v61, 1  ;;  %v4207_v30 = vld [vmem:[%s5978_s7 + $0x48] sm:$0xff]   ;;  %v4216_v12 = vld [vmem:[%s5978_s7 + $0x90] sm:$0xff]   ;;  %v4217_v20 = vld [vmem:[%s5978_s7 + $0x18] sm:$0xff]  }
 0x302   :  { %v2606_v18 = vsel %vm1219_vm10, %v2605_v19, %v2604_v52  ;;  %v2618_v41 = vsel %vm1217_vm7, %v2617_v56, %v2616_v14  ;;  %v2479_v33 = vpack.c.bf16 %v2476_v11, %v2477_v13  ;;  %v2435_v26 = vsel %vm1286_vm15, %v2429_v25, %v2430_v40  ;;  %v4208_v19 = vld [vmem:[%s5978_s7 + $0x80] sm:$0xff]   ;;  %v4212_v36 = vld [vmem:[%s5978_s7 + $0x88] sm:$0xff]   ;;  %v4213_v56 = vld [vmem:[%s5978_s7 + $0x10] sm:$0xff]  }
 0x303   :  { %v2620_v10 = vsel %vm1219_vm10, %v2619_v9, %v2618_v41  ;;  %v2431_v4 = vrot.slane %v5621_v15, 7  ;;  %v2436_v55 = vsel %vm1286_vm15, %v2432_v21, %v2429_v25  ;;  %v2475_v45 = vsel %vm1371_vm14, %v2473_v51, %v2474_v49  ;;  %v4214_v9 = vld [vmem:[%s5978_s7 + $0xd0] sm:$0xff]   ;;  %v4220_v52 = vld [vmem:[%s5978_s7 + $0x98] sm:$0xff]   ;;  %v4221_v3 = vld [vmem:[%s5978_s7 + $0x20] sm:$0xff]  }
 0x304   :  { %v2622_v48 = vpack.c.b16 %v2620_v10, %v2606_v18  ;;  %v2478_v59 = vsel %vm1371_vm14, %v2474_v49, %v2471_v8  ;;  %v2437_v37 = vpack.c.bf16 %v2435_v26, %v2436_v55  ;;  %v2491_v61 = vrot.slane %v5595_v6, 3  ;;  %v4218_v8 = vld [vmem:[%s5978_s7 + $0xd8] sm:$0xff]   ;;  %v4222_v51 = vld [vmem:[%s5978_s7 + $0xe0] sm:$0xff]   ;;  %v4223_v25 = vld [vmem:[%s5978_s7 + $0x68] sm:$0xff]  }
 0x305   :  { %v2480_v2 = vpack.c.bf16 %v2478_v59, %v2475_v45  ;;  %v2433_v63 = vsel %vm1286_vm15, %v2431_v4, %v2432_v21  ;;  %v2434_v57 = vsel %vm1286_vm15, %v2430_v40, %v2431_v4  ;;  %v2492_v43 = vrot.slane %v5615_v7, 3  ;;  %v4224_v18 = vld [vmem:[%s5978_s7 + $0xa0] sm:$0xff]   ;;  %v4225_v14 = vld [vmem:[%s5978_s7 + $0x28] sm:$0xff]   ;;  %v4227_v40 = vld [vmem:[%s5978_s7 + $0x70] sm:$0xff]  }
 0x306   :  { %2625 = vrot.lane.b32.xlu1 %v2622_v48, %s4287_s13  ;;  %v2438_v35 = vpack.c.bf16 %v2433_v63, %v2434_v57  ;;  %v2493_v46 = vrot.slane %v5621_v15, 3  ;;  %v2498_v1 = vsel %vm1413_vm11, %v2494_v53, %v2491_v61  ;;  %v4201_v15 = vld [vmem:[%s5976_s5 + $0x88] sm:$0xff]   ;;  %v4229_v11 = vld [vmem:[%s5978_s7 + $0x30] sm:$0xff]   ;;  %v4231_v49 = vld [vmem:[%s5978_s7 + $0x78] sm:$0xff]   ;;  %v4289_v55 = vmov 0.0  }
 0x307   :  { %v2497_v42 = vsel %vm1413_vm11, %v2491_v61, %v2492_v43  ;;  %v4226_v13 = vld [vmem:[%s5978_s7 + $0xe8] sm:$0xff]   ;;  %v4230_v21 = vld [vmem:[%s5978_s7 + $0xf0] sm:$0xff]   ;;  %v4234_v26 = vld [vmem:[%s5978_s7 + $0xf8] sm:$0xff]  }
 0x308   :  { %v2495_v23 = vsel %vm1413_vm11, %v2493_v46, %v2494_v53  ;;  %v2496_v60 = vsel %vm1413_vm11, %v2492_v43, %v2493_v46  ;;  %v4228_v41 = vld [vmem:[%s5978_s7 + $0xa8] sm:$0xff]   ;;  %v4232_v10 = vld [vmem:[%s5978_s7 + $0xb0] sm:$0xff]   ;;  %v4236_v4 = vld [vmem:[%s5978_s7 + $0x140] sm:$0xff]  }
 0x309   :  { %v2499_v38 = vpack.c.bf16 %v2496_v60, %v2497_v42  ;;  %v2500_v22 = vpack.c.bf16 %v2498_v1, %v2495_v23  ;;  %v4235_v48 = vld [vmem:[%s5978_s7 + $0xb8] sm:$0xff]   ;;  %v3903_v42 = vld [vmem:[%s5977_s6] ss:$0 sm:$0xff]  ;;  %v216_v1 = vadd.s32 8, %v4412_v29 }
 0x36d   :  { %v2624_v27 = vpop.permute.xlu1 %2623 }
 0x36e   :  { %v2630_v6 = vpop.permute.xlu0 %2629  ;;  %v2635_v31 = vsel %vm1715_vm0, %v2437_v37, %v2624_v27 }
 0x36f   :  { %v2643_v7 = vsel %vm1715_vm0, %v2479_v33, %v2630_v6  ;;  %v4233_v33 = vld [vmem:[%s5978_s7 + $0x38] sm:$0xff]   ;;  %v2927_v6 = vand.u32 15, %v5321_v28 }
 0x370   :  { %2854 = vmatprep.mubr.bf16.mxu0 %v2643_v7 }
 0x371   :  { %2855 = vmatmul.mubr.bf16.vlgmr.msra.gmra.mrb[0].mxu0 %v2635_v31  ;;  %vm2931_vm3 = vcmp.lt.s32.totalorder %v2927_v6, 12 }
 0x372   :  { %4133 = vmatpush3.bf16.msra.mxu0 %v5567_v5  ;;  %v2632_v0 = vpop.permute.xlu0 %2631  ;;  %v4204_v5 = vld [vmem:[%s5978_s7 + $0x40] sm:$0xff]  }
 0x373   :  { %4134 = vmatprep.subr.bf16.mxu0 %v4201_v15  ;;  %v2647_v53 = vsel %vm1715_vm0, %v2480_v2, %v2632_v0  ;;  %4039 = vmatprep.subr.bf16.mxu1 %v4204_v5  ;;  %v4290_v0 = vmov 1934713408  }
 0x374   :  { %2862 = vmatprep.mubr.bf16.mxu0 %v2647_v53  ;;  %4040 = vmatpush3.bf16.msra.mxu1 %v4205_v54  ;;  %v3112_v53 = vunpack.c.l.s4 %v4290_v0 }
 0x375   :  { %4041 = vmatprep.subr.bf16.mxu1 %v4207_v30 }
 0x376   :  { %4135 = vmatpush3.bf16.msra.mxu0 %v4201_v15  ;;  %v3113_v28 = vunpack.c.0.s8 %v3112_v53 }
 0x377   :  { %4136 = vmatprep.subr.bf16.mxu0 %v4202_v32 }
 0x378   :  { %v2626_v17 = vpop.permute.xlu1 %2625  ;;  %4042 = vmatpush3.bf16.msra.mxu1 %v4209_v58 }
 0x379   :  { %v2639_v47 = vsel %vm1715_vm0, %v2438_v35, %v2626_v17  ;;  %4043 = vmatprep.subr.bf16.mxu1 %v4211_v62 }
 0x37a   :  { %2863 = vmatmul.mubr.bf16.gmra.mrb[4].mxu0 %v2639_v47  ;;  %v2925_v47 = vand.u32 15, %v216_v1 }
 0x37b   :  { %4137 = vmatpush3.bf16.msra.mxu0 %v4202_v32  ;;  %4140 = vmatprep.mubr.msk.bf16.mxu0 %vm1715_vm0, %v2499_v38 }
 0x37c   :  { %4138 = vmatprep.subr.bf16.mxu0 %v4203_v16  ;;  %4044 = vmatpush3.bf16.msra.mxu1 %v4213_v56  ;;  %vm5833_vm5 = vcmp.lt.s32.totalorder %v2925_v47, 12 }
 0x37d   :  { %4045 = vmatprep.subr.bf16.mxu1 %v4215_v50 }
 0x37f   :  { %4139 = vmatpush3.bf16.msra.mxu0 %v4203_v16 }
 0x380   :  { %4061 = vmatprep.subr.bf16.mxu0 %v4206_v44  ;;  %4046 = vmatpush3.bf16.msra.mxu1 %v4217_v20 }
 0x381   :  { %4047 = vmatprep.subr.bf16.mxu1 %v4219_v39 }
 0x382   :  { %4141 = vmatmul.mubr.msk.bf16.vlgmr.msra.gmra.mrb[8].mxu0 %vm1715_vm0, %v2500_v22 }
 0x383   :  { %4062 = vmatpush3.bf16.msra.mxu0 %v4208_v19 }
 0x384   :  { %4063 = vmatprep.subr.bf16.mxu0 %v4210_v24  ;;  %4048 = vmatpush3.bf16.msra.mxu1 %v4221_v3 }
 0x385   :  { %4049 = vmatprep.subr.bf16.mxu1 %v4223_v25 }
 0x387   :  { %4064 = vmatpush3.bf16.msra.mxu0 %v4212_v36 }
 0x388   :  { %4065 = vmatprep.subr.bf16.mxu0 %v4214_v9  ;;  %4050 = vmatpush3.bf16.msra.mxu1 %v4225_v14 }
 0x389   :  { %4051 = vmatprep.subr.bf16.mxu1 %v4227_v40 }
 0x38b   :  { %4066 = vmatpush3.bf16.msra.mxu0 %v4216_v12 }
 0x38c   :  { %4067 = vmatprep.subr.bf16.mxu0 %v4218_v8  ;;  %4052 = vmatpush3.bf16.msra.mxu1 %v4229_v11 }
 0x38d   :  { %4053 = vmatprep.subr.bf16.mxu1 %v4231_v49 }
 0x38f   :  { %4068 = vmatpush3.bf16.msra.mxu0 %v4220_v52 }
 0x390   :  { %4069 = vmatprep.subr.bf16.mxu0 %v4222_v51  ;;  %4054 = vmatpush3.bf16.msra.mxu1 %v4233_v33 }
 0x391   :  { %4083 = vmatprep.subr.bf16.mxu1 %v4236_v4 }
 0x393   :  { %4070 = vmatpush3.bf16.msra.mxu0 %v4224_v18 }
 0x394   :  { %4071 = vmatprep.subr.bf16.mxu0 %v4226_v13  ;;  %v5841_v13 = vsub.s32 %v3113_v28, %v4412_v29 }
 0x397   :  { %4072 = vmatpush3.bf16.msra.mxu0 %v4228_v41 }
 0x398   :  { %4073 = vmatprep.subr.bf16.mxu0 %v4230_v21 }
 0x39b   :  { %4074 = vmatpush3.bf16.msra.mxu0 %v4232_v10 }
 0x39c   :  { %4075 = vmatprep.subr.bf16.mxu0 %v4234_v26 }
 0x39f   :  { %4076 = vmatpush3.bf16.msra.mxu0 %v4235_v48 }
 0x3a0   :  { %4144 = vmatprep.subr.bf16.mxu0 %v4289_v55 }
 0x444   :  { %v4021_v45 = vpop.f32.mrb[0].mxu0 }
 0x445   :  { %v4022_v59 = vpop.f32.mrb[1].mxu0 }
 0x446   :  { %v4023_v37 = vadd.f32 %v4022_v59, %v4021_v45  ;;  %v4024_v2 = vpop.f32.mrb[2].mxu0 }
 0x447   :  { %v4025_v63 = vpop.f32.mrb[3].mxu0 }
 0x448   :  { %v4026_v57 = vadd.f32 %v4025_v63, %v4024_v2  ;;  %v2857_v27 = vadd.f32 %v4023_v37, %v3903_v42 }
 0x44a   :  { %v2860_v16 = vadd.f32 %v4026_v57, %v3903_v42 }
 0x44d   :  { %v4027_v35 = vpop.f32.mrb[4].mxu0 }
 0x44e   :  { %v4028_v61 = vpop.f32.mrb[5].mxu0 }
 0x44f   :  { %v4029_v43 = vadd.f32 %v4028_v61, %v4027_v35  ;;  %v4030_v46 = vpop.f32.mrb[6].mxu0 }
 0x450   :  { %v4031_v23 = vpop.f32.mrb[7].mxu0 }
 0x451   :  { %v4032_v60 = vadd.f32 %v4031_v23, %v4030_v46  ;;  %v2865_v38 = vadd.f32 %v4029_v43, %v3903_v42 }
 0x453   :  { %v2868_v31 = vadd.f32 %v4032_v60, %v3903_v42 }
 0x455   :  { %v4142_v22 = vpop.f32.mrb[8].mxu0 }
 0x456   :  { %v2914_v7 = vadd.f32 %v4142_v22, %v2865_v38  ;;  %v2905_v15 = vpop.f32.mrb[9].mxu0 }
 0x457   :  { %v2906_v32 = vadd.f32 %v2905_v15, %v2857_v27  ;;  %v4143_v17 = vpop.f32.mrb[10].mxu0 }
 0x458   :  { %v2922_v5 = vmax.f32 %v2914_v7, 0.0  ;;  %v2917_v54 = vadd.f32 %v4143_v17, %v2868_v31  ;;  %v2908_v44 = vpop.f32.mrb[11].mxu0 }
 0x459   :  { %v2920_v30 = vmax.f32 %v2906_v32, 0.0  ;;  %v2909_v19 = vadd.f32 %v2908_v44, %v2860_v16 }
 0x45a   :  { %v2965_v58 = vcombine.high %v2922_v5, %v2922_v5  ;;  %v2972_v24 = vrot.slane %v2922_v5, %v4421_v34  ;;  %v2923_v62 = vmax.f32 %v2917_v54, 0.0 }
 0x45b   :  { %v2940_v36 = vcombine.high %v2920_v30, %v2920_v30  ;;  %v2947_v56 = vrot.slane %v2920_v30, %v4421_v34  ;;  %v2921_v14 = vmax.f32 %v2909_v19, 0.0 }
 0x45c   :  { %v2979_v50 = vrot.slane %v2965_v58, %v4421_v34  ;;  %v2980_v12 = vcombine.high %v2972_v24, %v2972_v24  ;;  %v3932_v20 = vrot.slane %v2972_v24, 9  ;;  %v2935_v8 = vsel %vm2931_vm3, %v2923_v62, 0.0 }
 0x45d   :  { %v2954_v39 = vrot.slane %v2940_v36, %v4421_v34  ;;  %v2955_v52 = vcombine.high %v2947_v56, %v2947_v56  ;;  %v3926_v3 = vrot.slane %v2947_v56, 9  ;;  %v2988_v51 = vrot.slane %v2935_v8, %v4421_v34 }
 0x45e   :  { %v2981_v25 = vcombine.high %v2979_v50, %v2979_v50  ;;  %v3933_v18 = vrot.slane %v2980_v12, 9  ;;  %v3934_v40 = vrot.slane %v2979_v50, 9  ;;  %v3044_v41 = vmax.f32 %v2972_v24, %v3932_v20 }
 0x45f   :  { %v2956_v11 = vcombine.high %v2954_v39, %v2954_v39  ;;  %v3927_v21 = vrot.slane %v2955_v52, 9  ;;  %v3928_v33 = vrot.slane %v2954_v39, 9  ;;  %v2989_v26 = vcombine.high %v2988_v51, %v2988_v51 }
 0x460   :  { %v3935_v49 = vrot.slane %v2981_v25, 9  ;;  %v3045_v10 = vmax.f32 %v2980_v12, %v3933_v18  ;;  %v3038_v48 = vmax.f32 %v2947_v56, %v3926_v3  ;;  %v3936_v59 = vrot.slane %v2988_v51, 9 }
 0x461   :  { %v3929_v4 = vrot.slane %v2956_v11, 9  ;;  %v3039_v45 = vmax.f32 %v2955_v52, %v3927_v21  ;;  %v3937_v63 = vrot.slane %v2989_v26, 9  ;;  %v2933_v57 = vsel %vm5833_vm5, %v2921_v14, 0.0  ;;  %v4237_v14 = vld [vmem:[%s5978_s7 + $0x100] sm:$0xff]  }
 0x462   :  { %v3047_v37 = vmax.f32 %v2981_v25, %v3935_v49  ;;  %v3085_v2 = vrot.slane %v3045_v10, 7  ;;  %v3046_v29 = vmax.f32 %v2979_v50, %v3934_v40  ;;  %v2963_v43 = vrot.slane %v2933_v57, %v4421_v34  ;;  %v4238_v49 = vld [vmem:[%s5978_s7 + $0x148] sm:$0xff]   ;;  %v4245_v57 = vld [vmem:[%s5978_s7 + $0x120] sm:$0xff]  }
 0x463   :  { %v3041_v35 = vmax.f32 %v2956_v11, %v3929_v4  ;;  %v3064_v61 = vrot.slane %v3039_v45, 7  ;;  %v3040_v60 = vmax.f32 %v2954_v39, %v3928_v33  ;;  %v3049_v42 = vmax.f32 %v2989_v26, %v3937_v63  ;;  %v4239_v4 = vld [vmem:[%s5978_s7 + $0x108] sm:$0xff]   ;;  %v4240_v45 = vld [vmem:[%s5978_s7 + $0x150] sm:$0xff]   ;;  %v4244_v63 = vld [vmem:[%s5978_s7 + $0x160] sm:$0xff]  }
 0x464   :  { %v3086_v46 = vsel %vm1207_vm2, %v3085_v2, %v3044_v41  ;;  %v3092_v23 = vrot.slane %v3047_v37, 7  ;;  %v3048_v22 = vmax.f32 %v2988_v51, %v3936_v59  ;;  %v2964_v27 = vcombine.high %v2963_v43, %v2963_v43  ;;  %v4242_v37 = vld [vmem:[%s5978_s7 + $0x158] sm:$0xff]  }
 0x465   :  { %v3065_v1 = vsel %vm1207_vm2, %v3064_v61, %v3038_v48  ;;  %v3071_v38 = vrot.slane %v3041_v35, 7  ;;  %v3099_v7 = vrot.slane %v3049_v42, 7  ;;  %v3087_v31 = vsel %vm1211_vm4, %v3085_v2, %v3086_v46  ;;  %v4247_v35 = vld [vmem:[%s5978_s7 + $0x128] sm:$0xff]   ;;  %v4250_v46 = vld [vmem:[%s5978_s7 + $0x178] sm:$0xff]   ;;  %v4252_v42 = vld [vmem:[%s5980_s9] sm:$0xff]  }
 0x466   :  { %v3093_v6 = vsel %vm1207_vm2, %v3092_v23, %v3046_v29  ;;  %v3066_v15 = vsel %vm1211_vm4, %v3064_v61, %v3065_v1  ;;  %v3930_v34 = vrot.slane %v2963_v43, 9  ;;  %v3931_v53 = vrot.slane %v2964_v27, 9  ;;  %v4246_v29 = vld [vmem:[%s5978_s7 + $0x168] sm:$0xff]  }
 0x467   :  { %v3072_v0 = vsel %vm1207_vm2, %v3071_v38, %v3040_v60  ;;  %v3067_v32 = vsel %vm1215_vm6, %v3064_v61, %v3066_v15  ;;  %v3100_v17 = vsel %vm1207_vm2, %v3099_v7, %v3048_v22  ;;  %v3088_v47 = vsel %vm1215_vm6, %v3085_v2, %v3087_v31  ;;  %v4253_v1 = vld [vmem:[%s5980_s9 + $0x8] sm:$0xff]   ;;  %v4255_v22 = vld [vmem:[%s5980_s9 + $0x18] sm:$0xff]  }
 0x468   :  { %v3068_v16 = vsel %vm1219_vm10, %v3064_v61, %v3067_v32  ;;  %v3073_v5 = vsel %vm1211_vm4, %v3071_v38, %v3072_v0  ;;  %v3043_v54 = vmax.f32 %v2964_v27, %v3931_v53  ;;  %v3089_v44 = vsel %vm1219_vm10, %v3085_v2, %v3088_v47  ;;  %v4243_v2 = vld [vmem:[%s5978_s7 + $0x118] sm:$0xff]   ;;  %v4248_v61 = vld [vmem:[%s5978_s7 + $0x170] sm:$0xff]   ;;  %v4256_v27 = vld [vmem:[%s5980_s9 + $0x20] sm:$0xff]  }
 0x469   :  { %v3074_v30 = vsel %vm1215_vm6, %v3071_v38, %v3073_v5  ;;  %v3094_v19 = vsel %vm1211_vm4, %v3092_v23, %v3093_v6  ;;  %v3110_v58 = vcombine.low %v3068_v16, %v3089_v44  ;;  %v3101_v28 = vsel %vm1211_vm4, %v3099_v7, %v3100_v17  ;;  %v4257_v6 = vld [vmem:[%s5980_s9 + $0x28] sm:$0xff]   ;;  %v4259_v15 = vld [vmem:[%s5980_s9 + $0x38] sm:$0xff]   ;;  %v3938_v0 = vld [vmem:[%s5979_s8] ss:$0 sm:$0xff] }
 0x46a   :  { %v3075_v24 = vsel %vm1219_vm10, %v3071_v38, %v3074_v30  ;;  %v3095_v62 = vsel %vm1215_vm6, %v3092_v23, %v3094_v19  ;;  %v3042_v36 = vmax.f32 %v2963_v43, %v3930_v34  ;;  %v3078_v56 = vrot.slane %v3043_v54, 7  ;;  %v4249_v43 = vld [vmem:[%s5978_s7 + $0x130] sm:$0xff]  }
 0x46b   :  { %v3096_v9 = vsel %vm1219_vm10, %v3092_v23, %v3095_v62  ;;  %v3102_v50 = vsel %vm1215_vm6, %v3099_v7, %v3101_v28  ;;  %v3117_v12 = vrot.slane %v3110_v58, %v5841_v13  ;;  %v4251_v23 = vld [vmem:[%s5978_s7 + $0x138] sm:$0xff]   ;;  %v4254_v38 = vld [vmem:[%s5980_s9 + $0x10] sm:$0xff]  }
 0x46c   :  { %v3119_v20 = vcombine.low %v3075_v24, %v3096_v9  ;;  %v3079_v8 = vsel %vm1207_vm2, %v3078_v56, %v3042_v36  ;;  %v3103_v51 = vsel %vm1219_vm10, %v3099_v7, %v3102_v50  ;;  %v4258_v7 = vld [vmem:[%s5980_s9 + $0x30] sm:$0xff]   ;;  %vm4291_vm2 = vmmov 0   ;;  %v3987_v50 = vld [vmem:[%s5981_s10] ss:$0 sm:$0xff] }
 0x46d   :  { %v3118_v39 = vcombine.high %v3117_v12, %v4289_v55  ;;  %v3080_v3 = vsel %vm1211_vm4, %v3078_v56, %v3079_v8  ;;  %v3137_v11 = vpack.c.bf16 %v3117_v12, %v3117_v12  ;;  %vm3767_vm4 = vcmask 58368  }
 0x46e   :  { %v3126_v52 = vrot.slane %v3119_v20, %v5841_v13  ;;  %v3081_v25 = vsel %vm1215_vm6, %v3078_v56, %v3080_v3 }
 0x46f   :  { %v3138_v18 = vpack.c.bf16 %v3118_v39, %v3118_v39  ;;  %v3082_v41 = vsel %vm1219_vm10, %v3078_v56, %v3081_v25 }
 0x470   :  { %v3127_v40 = vcombine.high %v3126_v52, %v4289_v55  ;;  %v3128_v21 = vcombine.low %v3082_v41, %v3103_v51  ;;  %v3139_v33 = vpack.c.bf16 %v3126_v52, %v3126_v52 }
 0x471   :  { %3566 = vmatprep.mubr.bf16.mxu1 %v3138_v18 }
 0x472   :  { %v3140_v10 = vpack.c.bf16 %v3127_v40, %v3127_v40  ;;  %3567 = vmatmul.mubr.bf16.vlgmr.msra.gmra.mrb[32].mxu1 %v3137_v11  ;;  %v3135_v26 = vrot.slane %v3128_v21, %v5841_v13  ;;  %v4241_v13 = vld [vmem:[%s5978_s7 + $0x110] sm:$0xff]  }
 0x473   :  { %4084 = vmatpush3.bf16.msra.mxu1 %v4237_v14 }
 0x474   :  { %3606 = vmatprep.mubr.bf16.mxu0 %v3140_v10  ;;  %v3136_v48 = vcombine.high %v3135_v26, %v4289_v55  ;;  %4085 = vmatprep.subr.bf16.mxu1 %v4238_v49  ;;  %v3141_v60 = vpack.c.bf16 %v3135_v26, %v3135_v26 }
 0x475   :  { %3607 = vmatmul.mubr.bf16.vlgmr.msra.gmra.mrb[12].mxu0 %v3139_v33 }
 0x476   :  { %v3142_v59 = vpack.c.bf16 %v3136_v48, %v3136_v48  ;;  %4145 = vmatpush3.bf16.msra.mxu0 %v4252_v42  ;;  %4160 = vmatprep.mubr.msk.bf16.mxu0 %vm4291_vm2, %v4289_v55 }
 0x477   :  { %4086 = vmatpush3.bf16.msra.mxu1 %v4239_v4  ;;  %4146 = vmatprep.subr.bf16.mxu0 %v4289_v55 }
 0x478   :  { %3646 = vmatprep.mubr.bf16.mxu1 %v3142_v59  ;;  %4087 = vmatprep.subr.bf16.mxu1 %v4240_v45 }
 0x47a   :  { %4147 = vmatpush3.bf16.msra.mxu0 %v4253_v1 }
 0x47b   :  { %4088 = vmatpush3.bf16.msra.mxu1 %v4241_v13  ;;  %4148 = vmatprep.subr.bf16.mxu0 %v4289_v55 }
 0x47c   :  { %4089 = vmatprep.subr.bf16.mxu1 %v4242_v37 }
 0x47e   :  { %4149 = vmatpush3.bf16.msra.mxu0 %v4254_v38 }
 0x47f   :  { %4090 = vmatpush3.bf16.msra.mxu1 %v4243_v2  ;;  %4150 = vmatprep.subr.bf16.mxu0 %v4289_v55 }
 0x480   :  { %4091 = vmatprep.subr.bf16.mxu1 %v4244_v63 }
 0x482   :  { %4151 = vmatpush3.bf16.msra.mxu0 %v4255_v22 }
 0x483   :  { %4092 = vmatpush3.bf16.msra.mxu1 %v4245_v57  ;;  %4152 = vmatprep.subr.bf16.mxu0 %v4289_v55 }
 0x484   :  { %4093 = vmatprep.subr.bf16.mxu1 %v4246_v29 }
 0x486   :  { %4153 = vmatpush3.bf16.msra.mxu0 %v4256_v27 }
 0x487   :  { %4094 = vmatpush3.bf16.msra.mxu1 %v4247_v35  ;;  %4154 = vmatprep.subr.bf16.mxu0 %v4289_v55 }
 0x488   :  { %4095 = vmatprep.subr.bf16.mxu1 %v4248_v61 }
 0x48a   :  { %4155 = vmatpush3.bf16.msra.mxu0 %v4257_v6 }
 0x48b   :  { %4096 = vmatpush3.bf16.msra.mxu1 %v4249_v43  ;;  %4156 = vmatprep.subr.bf16.mxu0 %v4289_v55 }
 0x48c   :  { %4097 = vmatprep.subr.bf16.mxu1 %v4250_v46 }
 0x48e   :  { %4157 = vmatpush3.bf16.msra.mxu0 %v4258_v7 }
 0x48f   :  { %4098 = vmatpush3.bf16.msra.mxu1 %v4251_v23  ;;  %4158 = vmatprep.subr.bf16.mxu0 %v4289_v55 }
 0x492   :  { %3647 = vmatmul.mubr.bf16.vlgmr.msra.gmra.mrb[36].mxu1 %v3141_v60  ;;  %4159 = vmatpush3.bf16.msra.mxu0 %v4259_v15 }
 0x545   :  { %v4055_v31 = vpop.f32.mrb[32].mxu1 }
 0x546   :  { %v4056_v34 = vpop.f32.mrb[33].mxu1 }
 0x547   :  { %v4057_v53 = vadd.f32 %v4056_v34, %v4055_v31  ;;  %v4058_v32 = vpop.f32.mrb[34].mxu1 }
 0x548   :  { %v4077_v17 = vpop.f32.mrb[12].mxu0  ;;  %v4059_v16 = vpop.f32.mrb[35].mxu1 }
 0x549   :  { %v4078_v47 = vpop.f32.mrb[13].mxu0  ;;  %v3569_v5 = vadd.f32 %v4057_v53, %v3938_v0 }
 0x54a   :  { %v4079_v54 = vadd.f32 %v4078_v47, %v4077_v17  ;;  %v4080_v44 = vpop.f32.mrb[14].mxu0 }
 0x54b   :  { %v4081_v30 = vpop.f32.mrb[15].mxu0 }
 0x54c   :  { %v3609_v19 = vadd.f32 %v4079_v54, %v3569_v5 }
 0x565   :  { %v4099_v58 = vpop.f32.mrb[36].mxu1 }
 0x566   :  { %v4100_v24 = vpop.f32.mrb[37].mxu1 }
 0x567   :  { %v4101_v55 = vadd.f32 %v4100_v24, %v4099_v58  ;;  %v4102_v62 = vpop.f32.mrb[38].mxu1 }
 0x568   :  { %v4103_v28 = vpop.f32.mrb[39].mxu1 }
 0x569   :  { %v3649_v36 = vadd.f32 %v4101_v55, %v3609_v19 }
 0x56b   :  { %v3654_v56 = vmax.f32 %v3649_v36, 0.0 }
 0x56d   :  { %v3655_v9 = vpack.c.bf16 %v3654_v56, %v3654_v56 }
 0x56f   :  { %4161 = vmatmul.mubr.bf16.vlgmr.msra.gmra.mrb[16].mxu0 %v3655_v9 }
 0x642   :  { %v3761_v12 = vpop.f32.mrb[16].mxu0 }
 0x643   :  { %v3762_v20 = vadd.f32 %v3987_v50, %v3761_v12  ;;  %v4162_v8 = vpop.f32.mrb[17].mxu0 }
 0x644   :  { %v3764_v39 = vpop.f32.mrb[18].mxu0 }
 0x645   :  { %v4163_v52 = vpop.f32.mrb[19].mxu0  ;;  %3768 = vst.msk [vmem:[#allocation2] sm:$0x3] %vm3767_vm4, %v3762_v20 }
 0x646   :  { %4271 = shalt.err (!%p4268_p4)
}
 0x647   :  { %s4272_s10 = scalar_lea.hbm %s5982_s11, 32 }
 0x648   :  { %p4273_p5 = scmp.ne.s32.totalorder %s5982_s11, %s4272_s10  ;;  %p4276_p6 = scmp.lt.u32.totalorder %s4272_s10, %s5982_s11 }
 0x64a   :  { %p4278_p7 = pnand %p4276_p6, %p4273_p5 }
 0x64c   :  { %4281 = shalt.err (!%p4278_p7)
}
 0x64d   :  { %3778 = dma.vmem_to_hbm [thread:$0]  %s3776_s20, 32, %s5982_s11, [#allocation3]  }
 0x64e   :  { %4282 = dma.done.wait [#allocation3], 32  }
 0x64f   :  { %4283 = vsyncadd [#allocation3], 4294967264 }
 0x650   :  { %3782 = vsyncpa [#allocation3], 1 }

</bundles_post_ra>
